<compile_context>
chip_gen: v5e
topology: v5e:2x2
jax: 0.10.0
libtpu: 0.0.40
codegen_flags: <defaults>
</compile_context>

<pallas_src>
import jax
import jax.numpy as jnp
from jax import lax
from jax.experimental import pallas as pl
from jax.experimental.pallas import tpu as pltpu

# Interior column offset inside the padded depthwise scratch.  8 == one sublane
# group, so the big interior store is sublane-aligned (full-width vst).
_PAD_ALIGN = 8


# --------------------------------------------------------------------------------------
# Helpers (ported from the PyTorch reference)
# --------------------------------------------------------------------------------------
def make_divisible(value, divisor, min_value=None, round_down_protect=True):
    if min_value is None:
        min_value = divisor
    new_value = max(min_value, int(value + divisor / 2) // divisor * divisor)
    if round_down_protect and new_value < 0.9 * value:
        new_value += divisor
    return int(new_value)


def bn_fold(gamma, beta, mean, var, eps=1e-5):
    """Fold eval-mode BatchNorm into a per-channel (scale, shift)."""
    scale = gamma / jnp.sqrt(var + eps)
    shift = beta - mean * scale
    return scale, shift


def _conv_out(size, k, s):
    """Output spatial size of a 'same'-padded conv (padding = (k-1)//2)."""
    p = (k - 1) // 2
    return (size + 2 * p - k) // s + 1


def _tile_padded_bytes(shape, dtype_bytes=4):
    """f32 VMEM bytes after (8,128) tiling of the minor two dims (budgeting)."""
    *lead, s, l = shape
    n = 1
    for d in lead:
        n *= d
    return n * (-(-s // 8) * 8) * (-(-l // 128) * 128) * dtype_bytes


# --------------------------------------------------------------------------------------
# In-kernel stage helpers (operate on values / VMEM scratch refs)
# --------------------------------------------------------------------------------------
def _dw_stage(pad_ref, xin, w2d, shift, *, K, stride, Ho, Wo, relu6):
    """Depthwise KxK conv ('same' padding, given stride) + BN shift (+ ReLU6).

    pad_ref : VMEM scratch (Hin + 2p, Win + p + 8, C)
    xin     : (Hin, Win, C) float32 value
    w2d     : (K*K, C) float32 value (BN scale already folded in)
    shift   : (1, C)   float32 value
    returns : (Ho, Wo, C) float32 value
    """
    Hin, Win, C = xin.shape
    Hp, Wp, _ = pad_ref.shape
    p = (K - 1) // 2
    c_int = _PAD_ALIGN                      # sublane-aligned interior column offset

    # Zero ONLY the halo border (interior is fully overwritten each grid step;
    # no full-buffer memset, and no reliance on scratch state from step 0).
    if p > 0:
        pad_ref[0:p, :, :] = jnp.zeros((p, Wp, C), jnp.float32)                       # top
        pad_ref[p + Hin:Hp, :, :] = jnp.zeros((Hp - p - Hin, Wp, C), jnp.float32)     # bottom
    pad_ref[p:p + Hin, 0:c_int, :] = jnp.zeros((Hin, c_int, C), jnp.float32)          # left
    if Wp - c_int - Win > 0:
        pad_ref[p:p + Hin, c_int + Win:Wp, :] = jnp.zeros(
            (Hin, Wp - c_int - Win, C), jnp.float32)                                  # right
    # Aligned full-width interior store.
    pad_ref[p:p + Hin, c_int:c_int + Win, :] = xin

    acc = jnp.zeros((Ho, Wo, C), jnp.float32)
    for kh in range(K):
        for kw in range(K):
            col0 = c_int - p + kw           # static, >= 0 for any odd K <= 17
            wvec = w2d[kh * K + kw:kh * K + kw + 1, :]                 # (1, C)
            if stride == 1:
                tap = pad_ref[kh:kh + Ho, col0:col0 + Wo, :]           # (Ho, Wo, C)
            else:
                # Direct 2-D strided load per tap -- no row-compaction scratch,
                # the strided output is computed directly.
                tap = pad_ref[pl.ds(kh, Ho, stride), pl.ds(col0, Wo, stride), :]
            acc = acc + tap * wvec
    y = acc + shift
    if relu6:
        y = jnp.clip(y, 0.0, 6.0)
    return y


def _pw_stage(xin, w, shift, *, relu6):
    """1x1 conv + BN shift (+ ReLU6) as a single MXU matmul on (H*W, Cin).

    xin  : (H, W, Cin) float32 value
    w    : (Cin, Cout) float32 value (BN scale folded into output channels)
    shift: (1, Cout)   float32 value
    """
    H_, W_, Cin_ = xin.shape
    Cout_ = w.shape[1]
    y = jnp.dot(xin.reshape(H_ * W_, Cin_), w, preferred_element_type=jnp.float32)
    y = y + shift
    if relu6:
        y = jnp.clip(y, 0.0, 6.0)
    return y.reshape(H_, W_, Cout_)


# --------------------------------------------------------------------------------------
# Fused UIB kernel
# --------------------------------------------------------------------------------------
def _build_uib_kernel(cfg):
    (has_start, K0, s0, has_mid, K1, s1, H0, W0, H2, W2) = cfg

    def kernel(*refs):
        it = iter(refs)
        x_ref = next(it)
        if has_start:
            w0_ref, b0_ref = next(it), next(it)
        we_ref, be_ref = next(it), next(it)
        if has_mid:
            w1_ref, b1_ref = next(it), next(it)
        wp_ref, bp_ref = next(it), next(it)
        o_ref = next(it)
        pad0_ref = next(it) if has_start else None
        pad1_ref = next(it) if has_mid else None

        act = x_ref[0].astype(jnp.float32)                          # (H, W, Cin)

        # [optional] start depthwise + BN (no activation)
        if has_start:
            act = _dw_stage(pad0_ref, act, w0_ref[...], b0_ref[...],
                            K=K0, stride=s0, Ho=H0, Wo=W0, relu6=False)

        # expand 1x1 + BN + ReLU6 (MXU; stays in VMEM/vregs -- never hits HBM)
        act = _pw_stage(act, we_ref[...], be_ref[...], relu6=True)

        # [optional] middle depthwise (possibly strided) + BN + ReLU6
        if has_mid:
            act = _dw_stage(pad1_ref, act, w1_ref[...], b1_ref[...],
                            K=K1, stride=s1, Ho=H2, Wo=W2, relu6=True)

        # project 1x1 + BN (no activation)
        y = _pw_stage(act, wp_ref[...], bp_ref[...], relu6=False)
        o_ref[0] = y.astype(o_ref.dtype)

    return kernel


# --------------------------------------------------------------------------------------
# The block (public interface: NCHW in / NCHW out, like the PyTorch module)
# --------------------------------------------------------------------------------------
class UniversalInvertedBottleneckBlockPallas:
    def __init__(self, key, inp, oup, start_dw_kernel_size, middle_dw_kernel_size,
                 middle_dw_downsample, stride, expand_ratio):
        if start_dw_kernel_size:
            assert start_dw_kernel_size % 2 == 1, "start dw kernel size must be odd"
        if middle_dw_kernel_size:
            assert middle_dw_kernel_size % 2 == 1, "middle dw kernel size must be odd"

        self.inp = inp
        self.oup = oup
        self.start_dw_kernel_size = start_dw_kernel_size
        self.middle_dw_kernel_size = middle_dw_kernel_size
        self.middle_dw_downsample = middle_dw_downsample
        self.stride = stride
        self.expand_filters = make_divisible(inp * expand_ratio, 8)
        E = self.expand_filters

        keys = iter(jax.random.split(key, 32))

        def conv_w(shape):
            return 0.1 * jax.random.normal(next(keys), shape, jnp.float32)

        def bn_params(c):
            gamma = 0.5 + jax.random.uniform(next(keys), (c,), jnp.float32)
            beta = 0.1 * jax.random.normal(next(keys), (c,), jnp.float32)
            mean = 0.1 * jax.random.normal(next(keys), (c,), jnp.float32)
            var = 0.5 + jax.random.uniform(next(keys), (c,), jnp.float32)
            return bn_fold(gamma, beta, mean, var)

        # BN scale is folded into the conv weights at wrapper level; only the
        # per-channel shift is applied inside the kernel.
        if self.start_dw_kernel_size:
            K = start_dw_kernel_size
            w = conv_w((K, K, inp))
            scale, shift = bn_params(inp)
            self.w_start = w * scale            # (K, K, inp)
            self.b_start = shift                # (inp,)
            self.start_stride = stride if not middle_dw_downsample else 1

        w = conv_w((inp, E))
        scale, shift = bn_params(E)
        self.w_expand = w * scale[None, :]      # (inp, E)
        self.b_expand = shift                   # (E,)

        if self.middle_dw_kernel_size:
            K = middle_dw_kernel_size
            w = conv_w((K, K, E))
            scale, shift = bn_params(E)
            self.w_mid = w * scale              # (K, K, E)
            self.b_mid = shift                  # (E,)
            self.mid_stride = stride if middle_dw_downsample else 1

        w = conv_w((E, oup))
        scale, shift = bn_params(oup)
        self.w_proj = w * scale[None, :]        # (E, oup)
        self.b_proj = shift                     # (oup,)

    def __call__(self, x_nchw):
        # Public interface matches PyTorch (NCHW); the kernel runs NHWC internally
        # (channels on the lane axis).  Only the small in/out tensors are transposed;
        # the large expanded activation never leaves VMEM.
        x = jnp.transpose(x_nchw, (0, 2, 3, 1))
        B, H, W, Cin = x.shape
        E, Cout = self.expand_filters, self.oup

        has_start = bool(self.start_dw_kernel_size)
        has_mid = bool(self.middle_dw_kernel_size)
        K0 = self.start_dw_kernel_size
        K1 = self.middle_dw_kernel_size
        s0 = self.start_stride if has_start else 1
        s1 = self.mid_stride if has_mid else 1
        H0 = _conv_out(H, K0, s0) if has_start else H
        W0 = _conv_out(W, K0, s0) if has_start else W
        H2 = _conv_out(H0, K1, s1) if has_mid else H0
        W2 = _conv_out(W0, K1, s1) if has_mid else W0

        inputs = [x]
        in_specs = [pl.BlockSpec((1, H, W, Cin), lambda b: (b, 0, 0, 0))]

        def add_param(arr):  # all params are small 2D, replicated across the grid
            inputs.append(arr)
            in_specs.append(pl.BlockSpec(arr.shape, lambda b: (0, 0)))

        if has_start:
            add_param(self.w_start.reshape(K0 * K0, Cin))
            add_param(self.b_start.reshape(1, Cin))
        add_param(self.w_expand)                       # (Cin, E)
        add_param(self.b_expand.reshape(1, E))
        if has_mid:
            add_param(self.w_mid.reshape(K1 * K1, E))
            add_param(self.b_mid.reshape(1, E))
        add_param(self.w_proj)                         # (E, Cout)
        add_param(self.b_proj.reshape(1, Cout))

        scratch = []
        scratch_bytes = 0
        if has_start:
            p0 = (K0 - 1) // 2
            hp0, wp0 = H + 2 * p0, W + p0 + _PAD_ALIGN
            scratch.append(pltpu.VMEM((hp0, wp0, Cin), jnp.float32))
            scratch_bytes += _tile_padded_bytes((hp0, wp0, Cin))
        if has_mid:
            p1 = (K1 - 1) // 2
            hp1, wp1 = H0 + 2 * p1, W0 + p1 + _PAD_ALIGN
            scratch.append(pltpu.VMEM((hp1, wp1, E), jnp.float32))
            scratch_bytes += _tile_padded_bytes((hp1, wp1, E))

        # VMEM budget from the actual tile-padded footprint: double-buffered I/O
        # blocks + params + padded scratch + an allowance for the live expanded
        # activation / accumulators, with 2x headroom.  Capped at 64 MiB so the
        # same setting is legal on v7x (64 MiB physical) as well as v5e/v6e.
        io_bytes = 2 * (_tile_padded_bytes((1, H, W, Cin))
                        + _tile_padded_bytes((1, H2, W2, Cout)))
        param_bytes = 2 * sum(_tile_padded_bytes(a.shape) for a in inputs[1:])
        live_bytes = 4 * _tile_padded_bytes((H0, W0, E))
        vmem_limit = int(min(max(2 * (io_bytes + param_bytes + scratch_bytes + live_bytes),
                                 16 * 1024 * 1024), 64 * 1024 * 1024))

        kernel = _build_uib_kernel(
            (has_start, K0, s0, has_mid, K1, s1, H0, W0, H2, W2))

        out = pl.pallas_call(
            kernel,
            out_shape=jax.ShapeDtypeStruct((B, H2, W2, Cout), x.dtype),
            grid=(B,),
            in_specs=in_specs,
            out_specs=pl.BlockSpec((1, H2, W2, Cout), lambda b: (b, 0, 0, 0)),
            scratch_shapes=scratch,
            compiler_params=pltpu.CompilerParams(
                dimension_semantics=("parallel",),   # TODO(synk): CORE_PARALLEL + H-strips on v7x
                vmem_limit_bytes=vmem_limit),
        )(*inputs)
        return jnp.transpose(out, (0, 3, 1, 2))         # NHWC -> NCHW


# --------------------------------------------------------------------------------------
# Pure-JAX reference (for correctness check)
# --------------------------------------------------------------------------------------
def _ref_dw(x, w, b, stride):
    K, _, C = w.shape
    p = (K - 1) // 2
    y = lax.conv_general_dilated(
        x, w.reshape(K, K, 1, C), window_strides=(stride, stride),
        padding=((p, p), (p, p)), dimension_numbers=("NHWC", "HWIO", "NHWC"),
        feature_group_count=C)
    return y + b


def _ref_pw(x, w, b):
    Cin, Cout = w.shape
    y = lax.conv_general_dilated(
        x, w.reshape(1, 1, Cin, Cout), window_strides=(1, 1),
        padding=((0, 0), (0, 0)), dimension_numbers=("NHWC", "HWIO", "NHWC"))
    return y + b


def reference_forward(block, x_nchw):
    x = jnp.transpose(x_nchw, (0, 2, 3, 1))
    if block.start_dw_kernel_size:
        x = _ref_dw(x, block.w_start, block.b_start, block.start_stride)
    x = jnp.clip(_ref_pw(x, block.w_expand, block.b_expand), 0.0, 6.0)
    if block.middle_dw_kernel_size:
        x = jnp.clip(_ref_dw(x, block.w_mid, block.b_mid, block.mid_stride), 0.0, 6.0)
    x = _ref_pw(x, block.w_proj, block.b_proj)
    return jnp.transpose(x, (0, 3, 1, 2))


# --------------------------------------------------------------------------------------
if __name__ == "__main__":
    key = jax.random.PRNGKey(0)
    k_param, k_input = jax.random.split(key)

    # UIB config: inp=4, oup=8, start dw 3x3, middle dw 3x3 (downsample), stride 2, expand 4x
    block = UniversalInvertedBottleneckBlockPallas(
        k_param, inp=4, oup=8,
        start_dw_kernel_size=3, middle_dw_kernel_size=3,
        middle_dw_downsample=True, stride=2, expand_ratio=4.0)

    x = jax.random.normal(k_input, (2, 4, 16, 16), jnp.float32)  # NCHW like PyTorch

    out = jax.block_until_ready(block(x))
    ref = jax.block_until_ready(reference_forward(block, x))

    assert out.shape == (2, 8, 8, 8), out.shape
    err = float(jnp.max(jnp.abs(out - ref)))
    assert jnp.allclose(out, ref, rtol=1e-4, atol=1e-4), err

    print("KERNEL_OK")
</pallas_src>

<mosaic_0001>
module attributes {stable_mosaic.version = 11 : i64} {
  func.func @kernel(%arg0: i32, %arg1: memref<1x16x16x4xf32, #tpu.memory_space<vmem>>, %arg2: memref<9x4xf32, #tpu.memory_space<vmem>>, %arg3: memref<1x4xf32, #tpu.memory_space<vmem>>, %arg4: memref<4x16xf32, #tpu.memory_space<vmem>>, %arg5: memref<1x16xf32, #tpu.memory_space<vmem>>, %arg6: memref<9x16xf32, #tpu.memory_space<vmem>>, %arg7: memref<1x16xf32, #tpu.memory_space<vmem>>, %arg8: memref<16x8xf32, #tpu.memory_space<vmem>>, %arg9: memref<1x8xf32, #tpu.memory_space<vmem>>, %arg10: memref<1x8x8x8xf32, #tpu.memory_space<vmem>>, %arg11: memref<18x25x4xf32, #tpu.memory_space<vmem>>, %arg12: memref<18x25x16xf32, #tpu.memory_space<vmem>>) attributes {dimension_semantics = [#tpu.dimension_semantics<parallel>], iteration_bounds = array<i64: 2>, scalar_prefetch = 0 : i64, scratch_operands = 2 : i64, tpu.core_type = #tpu.core_type<tc>, window_params = [{transform_indices = @transform_0, window_bounds = array<i64: 1, 16, 16, 4>}, {pipeline_mode = #tpu.pipeline_mode<synchronous>, transform_indices = @transform_1, window_bounds = array<i64: 9, 4>}, {pipeline_mode = #tpu.pipeline_mode<synchronous>, transform_indices = @transform_2, window_bounds = array<i64: 1, 4>}, {pipeline_mode = #tpu.pipeline_mode<synchronous>, transform_indices = @transform_3, window_bounds = array<i64: 4, 16>}, {pipeline_mode = #tpu.pipeline_mode<synchronous>, transform_indices = @transform_4, window_bounds = array<i64: 1, 16>}, {pipeline_mode = #tpu.pipeline_mode<synchronous>, transform_indices = @transform_5, window_bounds = array<i64: 9, 16>}, {pipeline_mode = #tpu.pipeline_mode<synchronous>, transform_indices = @transform_6, window_bounds = array<i64: 1, 16>}, {pipeline_mode = #tpu.pipeline_mode<synchronous>, transform_indices = @transform_7, window_bounds = array<i64: 16, 8>}, {pipeline_mode = #tpu.pipeline_mode<synchronous>, transform_indices = @transform_8, window_bounds = array<i64: 1, 8>}, {transform_indices = @transform_9, window_bounds = array<i64: 1, 8, 8, 8>}]} {
    %c0 = arith.constant 0 : index
    %c0_0 = arith.constant 0 : index
    %c0_1 = arith.constant 0 : index
    %c0_2 = arith.constant 0 : index
    %0 = vector.load %arg1[%c0, %c0_0, %c0_1, %c0_2] : memref<1x16x16x4xf32, #tpu.memory_space<vmem>>, vector<1x16x16x4xf32>
    %1 = vector.shape_cast %0 : vector<1x16x16x4xf32> to vector<16x16x4xf32>
    %c0_3 = arith.constant 0 : index
    %c0_4 = arith.constant 0 : index
    %2 = vector.load %arg2[%c0_3, %c0_4] : memref<9x4xf32, #tpu.memory_space<vmem>>, vector<9x4xf32>
    %c0_5 = arith.constant 0 : index
    %c0_6 = arith.constant 0 : index
    %3 = vector.load %arg3[%c0_5, %c0_6] : memref<1x4xf32, #tpu.memory_space<vmem>>, vector<1x4xf32>
    %cst = arith.constant 0.000000e+00 : f32
    %4 = vector.broadcast %cst : f32 to vector<1x25x4xf32>
    %c0_7 = arith.constant 0 : index
    %c0_8 = arith.constant 0 : index
    %c0_9 = arith.constant 0 : index
    %5 = vector.load %arg11[%c0_7, %c0_8, %c0_9] : memref<18x25x4xf32, #tpu.memory_space<vmem>>, vector<1x25x4xf32>
    tpu.vector_store %arg11[%c0_7, %c0_8, %c0_9], %4 {strides = array<i32>} : memref<18x25x4xf32, #tpu.memory_space<vmem>>, vector<1x25x4xf32>,
    %cst_10 = arith.constant 0.000000e+00 : f32
    %6 = vector.broadcast %cst_10 : f32 to vector<1x25x4xf32>
    %c17 = arith.constant 17 : index
    %c0_11 = arith.constant 0 : index
    %c0_12 = arith.constant 0 : index
    %7 = vector.load %arg11[%c17, %c0_11, %c0_12] : memref<18x25x4xf32, #tpu.memory_space<vmem>>, vector<1x25x4xf32>
    tpu.vector_store %arg11[%c17, %c0_11, %c0_12], %6 {strides = array<i32>} : memref<18x25x4xf32, #tpu.memory_space<vmem>>, vector<1x25x4xf32>,
    %cst_13 = arith.constant 0.000000e+00 : f32
    %8 = vector.broadcast %cst_13 : f32 to vector<16x8x4xf32>
    %c1 = arith.constant 1 : index
    %c0_14 = arith.constant 0 : index
    %c0_15 = arith.constant 0 : index
    %9 = vector.load %arg11[%c1, %c0_14, %c0_15] : memref<18x25x4xf32, #tpu.memory_space<vmem>>, vector<16x8x4xf32>
    tpu.vector_store %arg11[%c1, %c0_14, %c0_15], %8 {strides = array<i32>} : memref<18x25x4xf32, #tpu.memory_space<vmem>>, vector<16x8x4xf32>,
    %cst_16 = arith.constant 0.000000e+00 : f32
    %10 = vector.broadcast %cst_16 : f32 to vector<16x1x4xf32>
    %c1_17 = arith.constant 1 : index
    %c24 = arith.constant 24 : index
    %c0_18 = arith.constant 0 : index
    %11 = vector.load %arg11[%c1_17, %c24, %c0_18] : memref<18x25x4xf32, #tpu.memory_space<vmem>>, vector<16x1x4xf32>
    tpu.vector_store %arg11[%c1_17, %c24, %c0_18], %10 {strides = array<i32>} : memref<18x25x4xf32, #tpu.memory_space<vmem>>, vector<16x1x4xf32>,
    %c1_19 = arith.constant 1 : index
    %c8 = arith.constant 8 : index
    %c0_20 = arith.constant 0 : index
    %12 = vector.load %arg11[%c1_19, %c8, %c0_20] : memref<18x25x4xf32, #tpu.memory_space<vmem>>, vector<16x16x4xf32>
    tpu.vector_store %arg11[%c1_19, %c8, %c0_20], %1 {strides = array<i32>} : memref<18x25x4xf32, #tpu.memory_space<vmem>>, vector<16x16x4xf32>,
    %cst_21 = arith.constant 0.000000e+00 : f32
    %13 = vector.broadcast %cst_21 : f32 to vector<16x16x4xf32>
    %14 = vector.extract_strided_slice %2 {offsets = [0, 0], sizes = [1, 4], strides = [1, 1]} : vector<9x4xf32> to vector<1x4xf32>
    %c0_22 = arith.constant 0 : index
    %c7 = arith.constant 7 : index
    %c0_23 = arith.constant 0 : index
    %15 = vector.load %arg11[%c0_22, %c7, %c0_23] : memref<18x25x4xf32, #tpu.memory_space<vmem>>, vector<16x16x4xf32>
    %16 = vector.shape_cast %14 : vector<1x4xf32> to vector<1x1x4xf32>
    %17 = vector.broadcast %16 : vector<1x1x4xf32> to vector<16x16x4xf32>
    %18 = arith.mulf %15, %17 : vector<16x16x4xf32>
    %19 = arith.addf %13, %18 : vector<16x16x4xf32>
    %20 = vector.extract_strided_slice %2 {offsets = [1, 0], sizes = [1, 4], strides = [1, 1]} : vector<9x4xf32> to vector<1x4xf32>
    %c0_24 = arith.constant 0 : index
    %c8_25 = arith.constant 8 : index
    %c0_26 = arith.constant 0 : index
    %21 = vector.load %arg11[%c0_24, %c8_25, %c0_26] : memref<18x25x4xf32, #tpu.memory_space<vmem>>, vector<16x16x4xf32>
    %22 = vector.shape_cast %20 : vector<1x4xf32> to vector<1x1x4xf32>
    %23 = vector.broadcast %22 : vector<1x1x4xf32> to vector<16x16x4xf32>
    %24 = arith.mulf %21, %23 : vector<16x16x4xf32>
    %25 = arith.addf %19, %24 : vector<16x16x4xf32>
    %26 = vector.extract_strided_slice %2 {offsets = [2, 0], sizes = [1, 4], strides = [1, 1]} : vector<9x4xf32> to vector<1x4xf32>
    %c0_27 = arith.constant 0 : index
    %c9 = arith.constant 9 : index
    %c0_28 = arith.constant 0 : index
    %27 = vector.load %arg11[%c0_27, %c9, %c0_28] : memref<18x25x4xf32, #tpu.memory_space<vmem>>, vector<16x16x4xf32>
    %28 = vector.shape_cast %26 : vector<1x4xf32> to vector<1x1x4xf32>
    %29 = vector.broadcast %28 : vector<1x1x4xf32> to vector<16x16x4xf32>
    %30 = arith.mulf %27, %29 : vector<16x16x4xf32>
    %31 = arith.addf %25, %30 : vector<16x16x4xf32>
    %32 = vector.extract_strided_slice %2 {offsets = [3, 0], sizes = [1, 4], strides = [1, 1]} : vector<9x4xf32> to vector<1x4xf32>
    %c1_29 = arith.constant 1 : index
    %c7_30 = arith.constant 7 : index
    %c0_31 = arith.constant 0 : index
    %33 = vector.load %arg11[%c1_29, %c7_30, %c0_31] : memref<18x25x4xf32, #tpu.memory_space<vmem>>, vector<16x16x4xf32>
    %34 = vector.shape_cast %32 : vector<1x4xf32> to vector<1x1x4xf32>
    %35 = vector.broadcast %34 : vector<1x1x4xf32> to vector<16x16x4xf32>
    %36 = arith.mulf %33, %35 : vector<16x16x4xf32>
    %37 = arith.addf %31, %36 : vector<16x16x4xf32>
    %38 = vector.extract_strided_slice %2 {offsets = [4, 0], sizes = [1, 4], strides = [1, 1]} : vector<9x4xf32> to vector<1x4xf32>
    %c1_32 = arith.constant 1 : index
    %c8_33 = arith.constant 8 : index
    %c0_34 = arith.constant 0 : index
    %39 = vector.load %arg11[%c1_32, %c8_33, %c0_34] : memref<18x25x4xf32, #tpu.memory_space<vmem>>, vector<16x16x4xf32>
    %40 = vector.shape_cast %38 : vector<1x4xf32> to vector<1x1x4xf32>
    %41 = vector.broadcast %40 : vector<1x1x4xf32> to vector<16x16x4xf32>
    %42 = arith.mulf %39, %41 : vector<16x16x4xf32>
    %43 = arith.addf %37, %42 : vector<16x16x4xf32>
    %44 = vector.extract_strided_slice %2 {offsets = [5, 0], sizes = [1, 4], strides = [1, 1]} : vector<9x4xf32> to vector<1x4xf32>
    %c1_35 = arith.constant 1 : index
    %c9_36 = arith.constant 9 : index
    %c0_37 = arith.constant 0 : index
    %45 = vector.load %arg11[%c1_35, %c9_36, %c0_37] : memref<18x25x4xf32, #tpu.memory_space<vmem>>, vector<16x16x4xf32>
    %46 = vector.shape_cast %44 : vector<1x4xf32> to vector<1x1x4xf32>
    %47 = vector.broadcast %46 : vector<1x1x4xf32> to vector<16x16x4xf32>
    %48 = arith.mulf %45, %47 : vector<16x16x4xf32>
    %49 = arith.addf %43, %48 : vector<16x16x4xf32>
    %50 = vector.extract_strided_slice %2 {offsets = [6, 0], sizes = [1, 4], strides = [1, 1]} : vector<9x4xf32> to vector<1x4xf32>
    %c2 = arith.constant 2 : index
    %c7_38 = arith.constant 7 : index
    %c0_39 = arith.constant 0 : index
    %51 = vector.load %arg11[%c2, %c7_38, %c0_39] : memref<18x25x4xf32, #tpu.memory_space<vmem>>, vector<16x16x4xf32>
    %52 = vector.shape_cast %50 : vector<1x4xf32> to vector<1x1x4xf32>
    %53 = vector.broadcast %52 : vector<1x1x4xf32> to vector<16x16x4xf32>
    %54 = arith.mulf %51, %53 : vector<16x16x4xf32>
    %55 = arith.addf %49, %54 : vector<16x16x4xf32>
    %56 = vector.extract_strided_slice %2 {offsets = [7, 0], sizes = [1, 4], strides = [1, 1]} : vector<9x4xf32> to vector<1x4xf32>
    %c2_40 = arith.constant 2 : index
    %c8_41 = arith.constant 8 : index
    %c0_42 = arith.constant 0 : index
    %57 = vector.load %arg11[%c2_40, %c8_41, %c0_42] : memref<18x25x4xf32, #tpu.memory_space<vmem>>, vector<16x16x4xf32>
    %58 = vector.shape_cast %56 : vector<1x4xf32> to vector<1x1x4xf32>
    %59 = vector.broadcast %58 : vector<1x1x4xf32> to vector<16x16x4xf32>
    %60 = arith.mulf %57, %59 : vector<16x16x4xf32>
    %61 = arith.addf %55, %60 : vector<16x16x4xf32>
    %62 = vector.extract_strided_slice %2 {offsets = [8, 0], sizes = [1, 4], strides = [1, 1]} : vector<9x4xf32> to vector<1x4xf32>
    %c2_43 = arith.constant 2 : index
    %c9_44 = arith.constant 9 : index
    %c0_45 = arith.constant 0 : index
    %63 = vector.load %arg11[%c2_43, %c9_44, %c0_45] : memref<18x25x4xf32, #tpu.memory_space<vmem>>, vector<16x16x4xf32>
    %64 = vector.shape_cast %62 : vector<1x4xf32> to vector<1x1x4xf32>
    %65 = vector.broadcast %64 : vector<1x1x4xf32> to vector<16x16x4xf32>
    %66 = arith.mulf %63, %65 : vector<16x16x4xf32>
    %67 = arith.addf %61, %66 : vector<16x16x4xf32>
    %68 = vector.shape_cast %3 : vector<1x4xf32> to vector<1x1x4xf32>
    %69 = vector.broadcast %68 : vector<1x1x4xf32> to vector<16x16x4xf32>
    %70 = arith.addf %67, %69 : vector<16x16x4xf32>
    %c0_46 = arith.constant 0 : index
    %c0_47 = arith.constant 0 : index
    %71 = vector.load %arg4[%c0_46, %c0_47] : memref<4x16xf32, #tpu.memory_space<vmem>>, vector<4x16xf32>
    %c0_48 = arith.constant 0 : index
    %c0_49 = arith.constant 0 : index
    %72 = vector.load %arg5[%c0_48, %c0_49] : memref<1x16xf32, #tpu.memory_space<vmem>>, vector<1x16xf32>
    %73 = vector.shape_cast %70 : vector<16x16x4xf32> to vector<256x4xf32>
    %cst_50 = arith.constant dense<0.000000e+00> : vector<256x16xf32>
    %74 = tpu.matmul %73, %71, %cst_50 {dimension_numbers = #tpu.dot_dimension_numbers<[1], [0], [0], [1], [0, 0, 1, 1], [], []>} : vector<256x4xf32>, vector<4x16xf32>, vector<256x16xf32> -> vector<256x16xf32>
    %75 = vector.broadcast %72 : vector<1x16xf32> to vector<256x16xf32>
    %76 = arith.addf %74, %75 : vector<256x16xf32>
    %cst_51 = arith.constant 0.000000e+00 : f32
    %cst_52 = arith.constant 6.000000e+00 : f32
    %77 = vector.broadcast %cst_51 : f32 to vector<256x16xf32>
    %78 = arith.maximumf %77, %76 : vector<256x16xf32>
    %79 = vector.broadcast %cst_52 : f32 to vector<256x16xf32>
    %80 = arith.minimumf %79, %78 : vector<256x16xf32>
    %81 = vector.shape_cast %80 : vector<256x16xf32> to vector<16x16x16xf32>
    %c0_53 = arith.constant 0 : index
    %c0_54 = arith.constant 0 : index
    %82 = vector.load %arg6[%c0_53, %c0_54] : memref<9x16xf32, #tpu.memory_space<vmem>>, vector<9x16xf32>
    %c0_55 = arith.constant 0 : index
    %c0_56 = arith.constant 0 : index
    %83 = vector.load %arg7[%c0_55, %c0_56] : memref<1x16xf32, #tpu.memory_space<vmem>>, vector<1x16xf32>
    %cst_57 = arith.constant 0.000000e+00 : f32
    %84 = vector.broadcast %cst_57 : f32 to vector<1x25x16xf32>
    %c0_58 = arith.constant 0 : index
    %c0_59 = arith.constant 0 : index
    %c0_60 = arith.constant 0 : index
    %85 = vector.load %arg12[%c0_58, %c0_59, %c0_60] : memref<18x25x16xf32, #tpu.memory_space<vmem>>, vector<1x25x16xf32>
    tpu.vector_store %arg12[%c0_58, %c0_59, %c0_60], %84 {strides = array<i32>} : memref<18x25x16xf32, #tpu.memory_space<vmem>>, vector<1x25x16xf32>,
    %cst_61 = arith.constant 0.000000e+00 : f32
    %86 = vector.broadcast %cst_61 : f32 to vector<1x25x16xf32>
    %c17_62 = arith.constant 17 : index
    %c0_63 = arith.constant 0 : index
    %c0_64 = arith.constant 0 : index
    %87 = vector.load %arg12[%c17_62, %c0_63, %c0_64] : memref<18x25x16xf32, #tpu.memory_space<vmem>>, vector<1x25x16xf32>
    tpu.vector_store %arg12[%c17_62, %c0_63, %c0_64], %86 {strides = array<i32>} : memref<18x25x16xf32, #tpu.memory_space<vmem>>, vector<1x25x16xf32>,
    %cst_65 = arith.constant 0.000000e+00 : f32
    %88 = vector.broadcast %cst_65 : f32 to vector<16x8x16xf32>
    %c1_66 = arith.constant 1 : index
    %c0_67 = arith.constant 0 : index
    %c0_68 = arith.constant 0 : index
    %89 = vector.load %arg12[%c1_66, %c0_67, %c0_68] : memref<18x25x16xf32, #tpu.memory_space<vmem>>, vector<16x8x16xf32>
    tpu.vector_store %arg12[%c1_66, %c0_67, %c0_68], %88 {strides = array<i32>} : memref<18x25x16xf32, #tpu.memory_space<vmem>>, vector<16x8x16xf32>,
    %cst_69 = arith.constant 0.000000e+00 : f32
    %90 = vector.broadcast %cst_69 : f32 to vector<16x1x16xf32>
    %c1_70 = arith.constant 1 : index
    %c24_71 = arith.constant 24 : index
    %c0_72 = arith.constant 0 : index
    %91 = vector.load %arg12[%c1_70, %c24_71, %c0_72] : memref<18x25x16xf32, #tpu.memory_space<vmem>>, vector<16x1x16xf32>
    tpu.vector_store %arg12[%c1_70, %c24_71, %c0_72], %90 {strides = array<i32>} : memref<18x25x16xf32, #tpu.memory_space<vmem>>, vector<16x1x16xf32>,
    %c1_73 = arith.constant 1 : index
    %c8_74 = arith.constant 8 : index
    %c0_75 = arith.constant 0 : index
    %92 = vector.load %arg12[%c1_73, %c8_74, %c0_75] : memref<18x25x16xf32, #tpu.memory_space<vmem>>, vector<16x16x16xf32>
    tpu.vector_store %arg12[%c1_73, %c8_74, %c0_75], %81 {strides = array<i32>} : memref<18x25x16xf32, #tpu.memory_space<vmem>>, vector<16x16x16xf32>,
    %cst_76 = arith.constant 0.000000e+00 : f32
    %93 = vector.broadcast %cst_76 : f32 to vector<8x8x16xf32>
    %94 = vector.extract_strided_slice %82 {offsets = [0, 0], sizes = [1, 16], strides = [1, 1]} : vector<9x16xf32> to vector<1x16xf32>
    %c0_77 = arith.constant 0 : index
    %c7_78 = arith.constant 7 : index
    %c0_79 = arith.constant 0 : index
    %95 = tpu.strided_load %arg12[%c0_77, %c7_78, %c0_79] {strides = array<i32: 2, 2, 1>} : memref<18x25x16xf32, #tpu.memory_space<vmem>>, vector<8x8x16xf32>
    %96 = vector.shape_cast %94 : vector<1x16xf32> to vector<1x1x16xf32>
    %97 = vector.broadcast %96 : vector<1x1x16xf32> to vector<8x8x16xf32>
    %98 = arith.mulf %95, %97 : vector<8x8x16xf32>
    %99 = arith.addf %93, %98 : vector<8x8x16xf32>
    %100 = vector.extract_strided_slice %82 {offsets = [1, 0], sizes = [1, 16], strides = [1, 1]} : vector<9x16xf32> to vector<1x16xf32>
    %c0_80 = arith.constant 0 : index
    %c8_81 = arith.constant 8 : index
    %c0_82 = arith.constant 0 : index
    %101 = tpu.strided_load %arg12[%c0_80, %c8_81, %c0_82] {strides = array<i32: 2, 2, 1>} : memref<18x25x16xf32, #tpu.memory_space<vmem>>, vector<8x8x16xf32>
    %102 = vector.shape_cast %100 : vector<1x16xf32> to vector<1x1x16xf32>
    %103 = vector.broadcast %102 : vector<1x1x16xf32> to vector<8x8x16xf32>
    %104 = arith.mulf %101, %103 : vector<8x8x16xf32>
    %105 = arith.addf %99, %104 : vector<8x8x16xf32>
    %106 = vector.extract_strided_slice %82 {offsets = [2, 0], sizes = [1, 16], strides = [1, 1]} : vector<9x16xf32> to vector<1x16xf32>
    %c0_83 = arith.constant 0 : index
    %c9_84 = arith.constant 9 : index
    %c0_85 = arith.constant 0 : index
    %107 = tpu.strided_load %arg12[%c0_83, %c9_84, %c0_85] {strides = array<i32: 2, 2, 1>} : memref<18x25x16xf32, #tpu.memory_space<vmem>>, vector<8x8x16xf32>
    %108 = vector.shape_cast %106 : vector<1x16xf32> to vector<1x1x16xf32>
    %109 = vector.broadcast %108 : vector<1x1x16xf32> to vector<8x8x16xf32>
    %110 = arith.mulf %107, %109 : vector<8x8x16xf32>
    %111 = arith.addf %105, %110 : vector<8x8x16xf32>
    %112 = vector.extract_strided_slice %82 {offsets = [3, 0], sizes = [1, 16], strides = [1, 1]} : vector<9x16xf32> to vector<1x16xf32>
    %c1_86 = arith.constant 1 : index
    %c7_87 = arith.constant 7 : index
    %c0_88 = arith.constant 0 : index
    %113 = tpu.strided_load %arg12[%c1_86, %c7_87, %c0_88] {strides = array<i32: 2, 2, 1>} : memref<18x25x16xf32, #tpu.memory_space<vmem>>, vector<8x8x16xf32>
    %114 = vector.shape_cast %112 : vector<1x16xf32> to vector<1x1x16xf32>
    %115 = vector.broadcast %114 : vector<1x1x16xf32> to vector<8x8x16xf32>
    %116 = arith.mulf %113, %115 : vector<8x8x16xf32>
    %117 = arith.addf %111, %116 : vector<8x8x16xf32>
    %118 = vector.extract_strided_slice %82 {offsets = [4, 0], sizes = [1, 16], strides = [1, 1]} : vector<9x16xf32> to vector<1x16xf32>
    %c1_89 = arith.constant 1 : index
    %c8_90 = arith.constant 8 : index
    %c0_91 = arith.constant 0 : index
    %119 = tpu.strided_load %arg12[%c1_89, %c8_90, %c0_91] {strides = array<i32: 2, 2, 1>} : memref<18x25x16xf32, #tpu.memory_space<vmem>>, vector<8x8x16xf32>
    %120 = vector.shape_cast %118 : vector<1x16xf32> to vector<1x1x16xf32>
    %121 = vector.broadcast %120 : vector<1x1x16xf32> to vector<8x8x16xf32>
    %122 = arith.mulf %119, %121 : vector<8x8x16xf32>
    %123 = arith.addf %117, %122 : vector<8x8x16xf32>
    %124 = vector.extract_strided_slice %82 {offsets = [5, 0], sizes = [1, 16], strides = [1, 1]} : vector<9x16xf32> to vector<1x16xf32>
    %c1_92 = arith.constant 1 : index
    %c9_93 = arith.constant 9 : index
    %c0_94 = arith.constant 0 : index
    %125 = tpu.strided_load %arg12[%c1_92, %c9_93, %c0_94] {strides = array<i32: 2, 2, 1>} : memref<18x25x16xf32, #tpu.memory_space<vmem>>, vector<8x8x16xf32>
    %126 = vector.shape_cast %124 : vector<1x16xf32> to vector<1x1x16xf32>
    %127 = vector.broadcast %126 : vector<1x1x16xf32> to vector<8x8x16xf32>
    %128 = arith.mulf %125, %127 : vector<8x8x16xf32>
    %129 = arith.addf %123, %128 : vector<8x8x16xf32>
    %130 = vector.extract_strided_slice %82 {offsets = [6, 0], sizes = [1, 16], strides = [1, 1]} : vector<9x16xf32> to vector<1x16xf32>
    %c2_95 = arith.constant 2 : index
    %c7_96 = arith.constant 7 : index
    %c0_97 = arith.constant 0 : index
    %131 = tpu.strided_load %arg12[%c2_95, %c7_96, %c0_97] {strides = array<i32: 2, 2, 1>} : memref<18x25x16xf32, #tpu.memory_space<vmem>>, vector<8x8x16xf32>
    %132 = vector.shape_cast %130 : vector<1x16xf32> to vector<1x1x16xf32>
    %133 = vector.broadcast %132 : vector<1x1x16xf32> to vector<8x8x16xf32>
    %134 = arith.mulf %131, %133 : vector<8x8x16xf32>
    %135 = arith.addf %129, %134 : vector<8x8x16xf32>
    %136 = vector.extract_strided_slice %82 {offsets = [7, 0], sizes = [1, 16], strides = [1, 1]} : vector<9x16xf32> to vector<1x16xf32>
    %c2_98 = arith.constant 2 : index
    %c8_99 = arith.constant 8 : index
    %c0_100 = arith.constant 0 : index
    %137 = tpu.strided_load %arg12[%c2_98, %c8_99, %c0_100] {strides = array<i32: 2, 2, 1>} : memref<18x25x16xf32, #tpu.memory_space<vmem>>, vector<8x8x16xf32>
    %138 = vector.shape_cast %136 : vector<1x16xf32> to vector<1x1x16xf32>
    %139 = vector.broadcast %138 : vector<1x1x16xf32> to vector<8x8x16xf32>
    %140 = arith.mulf %137, %139 : vector<8x8x16xf32>
    %141 = arith.addf %135, %140 : vector<8x8x16xf32>
    %142 = vector.extract_strided_slice %82 {offsets = [8, 0], sizes = [1, 16], strides = [1, 1]} : vector<9x16xf32> to vector<1x16xf32>
    %c2_101 = arith.constant 2 : index
    %c9_102 = arith.constant 9 : index
    %c0_103 = arith.constant 0 : index
    %143 = tpu.strided_load %arg12[%c2_101, %c9_102, %c0_103] {strides = array<i32: 2, 2, 1>} : memref<18x25x16xf32, #tpu.memory_space<vmem>>, vector<8x8x16xf32>
    %144 = vector.shape_cast %142 : vector<1x16xf32> to vector<1x1x16xf32>
    %145 = vector.broadcast %144 : vector<1x1x16xf32> to vector<8x8x16xf32>
    %146 = arith.mulf %143, %145 : vector<8x8x16xf32>
    %147 = arith.addf %141, %146 : vector<8x8x16xf32>
    %148 = vector.shape_cast %83 : vector<1x16xf32> to vector<1x1x16xf32>
    %149 = vector.broadcast %148 : vector<1x1x16xf32> to vector<8x8x16xf32>
    %150 = arith.addf %147, %149 : vector<8x8x16xf32>
    %cst_104 = arith.constant 0.000000e+00 : f32
    %cst_105 = arith.constant 6.000000e+00 : f32
    %151 = vector.broadcast %cst_104 : f32 to vector<8x8x16xf32>
    %152 = arith.maximumf %151, %150 : vector<8x8x16xf32>
    %153 = vector.broadcast %cst_105 : f32 to vector<8x8x16xf32>
    %154 = arith.minimumf %153, %152 : vector<8x8x16xf32>
    %c0_106 = arith.constant 0 : index
    %c0_107 = arith.constant 0 : index
    %155 = vector.load %arg8[%c0_106, %c0_107] : memref<16x8xf32, #tpu.memory_space<vmem>>, vector<16x8xf32>
    %c0_108 = arith.constant 0 : index
    %c0_109 = arith.constant 0 : index
    %156 = vector.load %arg9[%c0_108, %c0_109] : memref<1x8xf32, #tpu.memory_space<vmem>>, vector<1x8xf32>
    %157 = vector.shape_cast %154 : vector<8x8x16xf32> to vector<64x16xf32>
    %cst_110 = arith.constant dense<0.000000e+00> : vector<64x8xf32>
    %158 = tpu.matmul %157, %155, %cst_110 {dimension_numbers = #tpu.dot_dimension_numbers<[1], [0], [0], [1], [0, 0, 1, 1], [], []>} : vector<64x16xf32>, vector<16x8xf32>, vector<64x8xf32> -> vector<64x8xf32>
    %159 = vector.broadcast %156 : vector<1x8xf32> to vector<64x8xf32>
    %160 = arith.addf %158, %159 : vector<64x8xf32>
    %161 = vector.shape_cast %160 : vector<64x8xf32> to vector<8x8x8xf32>
    %c0_111 = arith.constant 0 : index
    %c0_112 = arith.constant 0 : index
    %c0_113 = arith.constant 0 : index
    %c0_114 = arith.constant 0 : index
    %162 = vector.load %arg10[%c0_111, %c0_112, %c0_113, %c0_114] : memref<1x8x8x8xf32, #tpu.memory_space<vmem>>, vector<1x8x8x8xf32>
    %163 = vector.shape_cast %162 : vector<1x8x8x8xf32> to vector<8x8x8xf32>
    %164 = vector.shape_cast %161 : vector<8x8x8xf32> to vector<1x8x8x8xf32>
    tpu.vector_store %arg10[%c0_111, %c0_112, %c0_113, %c0_114], %164 {strides = array<i32>} : memref<1x8x8x8xf32, #tpu.memory_space<vmem>>, vector<1x8x8x8xf32>,
    return
  }
  func.func @transform_0(%arg0: i32) -> (i32, i32, i32, i32) {
    %c0_i32 = arith.constant 0 : i32
    %c0_i32_0 = arith.constant 0 : i32
    %c0_i32_1 = arith.constant 0 : i32
    %c0_i32_2 = arith.constant 0 : i32
    return %arg0, %c0_i32, %c0_i32_0, %c0_i32_1 : i32, i32, i32, i32
  }
  func.func @transform_1(%arg0: i32) -> (i32, i32) {
    %c0_i32 = arith.constant 0 : i32
    %c0_i32_0 = arith.constant 0 : i32
    %c0_i32_1 = arith.constant 0 : i32
    return %c0_i32, %c0_i32_0 : i32, i32
  }
  func.func @transform_2(%arg0: i32) -> (i32, i32) {
    %c0_i32 = arith.constant 0 : i32
    %c0_i32_0 = arith.constant 0 : i32
    %c0_i32_1 = arith.constant 0 : i32
    return %c0_i32, %c0_i32_0 : i32, i32
  }
  func.func @transform_3(%arg0: i32) -> (i32, i32) {
    %c0_i32 = arith.constant 0 : i32
    %c0_i32_0 = arith.constant 0 : i32
    %c0_i32_1 = arith.constant 0 : i32
    return %c0_i32, %c0_i32_0 : i32, i32
  }
  func.func @transform_4(%arg0: i32) -> (i32, i32) {
    %c0_i32 = arith.constant 0 : i32
    %c0_i32_0 = arith.constant 0 : i32
    %c0_i32_1 = arith.constant 0 : i32
    return %c0_i32, %c0_i32_0 : i32, i32
  }
  func.func @transform_5(%arg0: i32) -> (i32, i32) {
    %c0_i32 = arith.constant 0 : i32
    %c0_i32_0 = arith.constant 0 : i32
    %c0_i32_1 = arith.constant 0 : i32
    return %c0_i32, %c0_i32_0 : i32, i32
  }
  func.func @transform_6(%arg0: i32) -> (i32, i32) {
    %c0_i32 = arith.constant 0 : i32
    %c0_i32_0 = arith.constant 0 : i32
    %c0_i32_1 = arith.constant 0 : i32
    return %c0_i32, %c0_i32_0 : i32, i32
  }
  func.func @transform_7(%arg0: i32) -> (i32, i32) {
    %c0_i32 = arith.constant 0 : i32
    %c0_i32_0 = arith.constant 0 : i32
    %c0_i32_1 = arith.constant 0 : i32
    return %c0_i32, %c0_i32_0 : i32, i32
  }
  func.func @transform_8(%arg0: i32) -> (i32, i32) {
    %c0_i32 = arith.constant 0 : i32
    %c0_i32_0 = arith.constant 0 : i32
    %c0_i32_1 = arith.constant 0 : i32
    return %c0_i32, %c0_i32_0 : i32, i32
  }
  func.func @transform_9(%arg0: i32) -> (i32, i32, i32, i32) {
    %c0_i32 = arith.constant 0 : i32
    %c0_i32_0 = arith.constant 0 : i32
    %c0_i32_1 = arith.constant 0 : i32
    %c0_i32_2 = arith.constant 0 : i32
    return %arg0, %c0_i32, %c0_i32_0, %c0_i32_1 : i32, i32, i32, i32
  }
}

</mosaic_0001>

<bundles_post_ra>
// kernel: tpu_custom_call.1
= control target key start
LH: loop header
LB: loop body
LE: loop exit
PB: predicated region body
PF: predicated region fallthrough
CT: control target
= control target key end

     0   :  { %14 = vsyncpa [#allocation5], 0  ;;  %s3820_s0 = inlined_call_operand.vmem [shape: f32[2,16,16,4], index: 0, kind: input, shape index: {}]   ;;  %s3821_s1 = inlined_call_operand.vmem [shape: f32[9,4], index: 1, kind: input, shape index: {}]   ;;  %s3822_s2 = inlined_call_operand.vmem [shape: f32[1,4], index: 2, kind: input, shape index: {}]   ;;  %s3823_s3 = inlined_call_operand.vmem [shape: f32[4,16], index: 3, kind: input, shape index: {}]   ;;  %s3824_s4 = inlined_call_operand.vmem [shape: f32[1,16], index: 4, kind: input, shape index: {}]   ;;  %s3825_s5 = inlined_call_operand.vmem [shape: f32[9,16], index: 5, kind: input, shape index: {}]   ;;  %s3826_s6 = inlined_call_operand.vmem [shape: f32[1,16], index: 6, kind: input, shape index: {}]   ;;  %s3827_s7 = inlined_call_operand.vmem [shape: f32[16,8], index: 7, kind: input, shape index: {}]   ;;  %s3828_s8 = inlined_call_operand.vmem [shape: f32[1,8], index: 8, kind: input, shape index: {}]   ;;  %s3829_s9 = inlined_call_operand.hbm [shape: f32[2,8,8,8], index: 9, kind: output, shape index: {}]  }
   0x1   :  { %16 = vsyncpa [#allocation5 + $0x1], 0  ;;  %s2464_s30 = smov 0   ;;  %s2466_s10 = smov 0  }
   0x2   :  { %s2468_s11 = smov 0   ;;  %s2470_s12 = smov 0  }
   0x3 LB: > { %s2485_s13 = sadd.s32 4294967295, %s2409_s12   ;;  %s2243_s14 = sadd.s32 4294967294, %s2409_s12   ;;  %s2409_s12 = sphi %s2470_s12, %s3907_s12   ;;  %s2405_s11 = sphi %s2468_s11, %s3906_s11   ;;  %s2401_s10 = sphi %s2466_s10, %s3905_s10   ;;  %s2397_s30 = sphi %s2464_s30, %s3904_s30  }
   0x4   : > { %s2489_s15 = sadd.s32 1, %s2409_s12   ;;  %s223_s16 = sadd.s32 1, %s2405_s11 }
   0x5   : > { %s220_s17 = ssub.s32 %s2409_s12, %s2489_s15  ;;  %p233_p0 = scmp.ne.s32.totalorder %s2405_s11, %s2401_s10 }
   0x6   : > { %p221_p1 = scmp.eq.s32.totalorder %s220_s17, 0  ;;  %p234_p2 = scmp.eq.s32.totalorder %s2485_s13, 1 }
   0x7   : > { %p239_p3 = scmp.ne.s32.totalorder %s2401_s10, %s2397_s30  ;;  %p240_p4 = scmp.eq.s32.totalorder %s2243_s14, 1 }
   0x8   : > { %s2500_s18 = scalar_select %p221_p1, %s2405_s11, %s223_s16  }
   0x9   : > { %p2502_p5 = por %p234_p2, %p233_p0  ;;  %p2506_p6 = por %p240_p4, %p239_p3 }
   0xa   : > { %p2246_p7 = scmp.ge.s32.totalorder %s2409_s12, 1  ;;  %p290_p8 = scmp.lt.s32.totalorder %s2409_s12, 3 }
   0xc   : > { %p291_p9 = pnand %p2246_p7, %p290_p8 }
   0xe   : > { %294 = sbr.rel (%p291_p9) target bundleno = 535 (0x217), region = 56 }
  0x13   : > { %v1351_v0 = vld [vmem:[%s3823_s3] sm:$0xf]  ;;  %vm1452_vm0 = vcmask 1043456   ;;  %p326_p10 = scmp.lt.s32.totalorder %s2485_s13, 1  ;;  %vm366_vm1 = vcmask 31744   ;;  %v3833_v1 = vmov 0.0  }
  0x14   : > { %2250 = vmatpush.msk.msra.mxu0 %vm1452_vm0, %v1351_v0  ;;  %2299 = vmatpush.msk.msra.mxu2 %vm1452_vm0, %v1351_v0  ;;  %367 = vst.msk [vmem:[#allocation2] sm:$0xff] %vm366_vm1, %v3833_v1  ;;  %v363_v2 = vld [vmem:[%s3821_s1] sm:$0xff]  ;;  %v364_v27 = vld [vmem:[%s3821_s1 + $0x8] sm:$0x1]  ;;  %vm370_vm2 = vcmask 24576   ;;  %vm1636_vm3 = vcmask 130048  }
  0x15   : > { %s327_s23 = scalar_select %p326_p10, %s2485_s13, 1  ;;  %2298 = vmatpush.msk.msra.mxu1 %vm1452_vm0, %v1351_v0  ;;  %2300 = vmatpush.msk.msra.mxu3 %vm1452_vm0, %v1351_v0  ;;  %368 = vst.msk [vmem:[#allocation2 + $0x8] sm:$0xff] %vm366_vm1, %v3833_v1  ;;  %v2540_v7 = vperm.slane %v363_v2, 0  ;;  %v2542_v8 = vperm.slane %v363_v2, 1  ;;  %v2545_v9 = vperm.slane %v363_v2, 2  ;;  %v2551_v15 = vperm.slane %v363_v2, 3 }
  0x16   : > { %369 = vst.msk [vmem:[#allocation2 + $0x10] sm:$0xff] %vm366_vm1, %v3833_v1  ;;  %v2553_v16 = vperm.slane %v363_v2, 4  ;;  %v2560_v19 = vperm.slane %v363_v2, 5  ;;  %v2576_v26 = vperm.slane %v363_v2, 6  ;;  %v2589_v31 = vperm.slane %v363_v2, 7  ;;  %s323_s22 = sand.u32 1, %s2401_s10  }
  0x17   : > { %s2296_s24 = sshll.u32 %s327_s23, 8  ;;  %378 = vst.msk [vmem:[#allocation2 + $0x20] sm:$0xff] %vm366_vm1, %v3833_v1  ;;  %v2599_v35 = vperm.slane %v364_v27, 0  ;;  %v365_v39 = vld [vmem:[%s3822_s2] sm:$0x1]  ;;  %s2247_s23 = sshll.u32 %s323_s22, 6 }
  0x18   : > { %s2529_s29 = scalar_lea.vmem %s3820_s0, %s2296_s24  ;;  %379 = vst.msk [vmem:[#allocation2 + $0x40] sm:$0xff] %vm366_vm1, %v3833_v1  ;;  %v2622_v43 = vperm.slane %v365_v39, 0  ;;  %vm2108_vm4 = vcmask 64512   ;;  %s325_s26 = scalar_lea.vmem [#allocation4], %s2247_s23 }
  0x19   : > { %v331_v3 = vld [vmem:[%s2529_s29] sm:$0xff]  ;;  %v332_v4 = vld [vmem:[%s2529_s29 + $0x8] sm:$0xff]  ;;  %v333_v5 = vld [vmem:[%s2529_s29 + $0x10] sm:$0xff]  ;;  %373 = vst.msk [vmem:[#allocation2 + $0x220] sm:$0xff] %vm366_vm1, %v3833_v1  ;;  %s2297_s27 = sshll.u32 %s2485_s13, 6  ;;  %s2130_s16 = sshll.u32 %s325_s26, 4  ;;  %s2131_s16 = int_to_ptr.vmem [resolvable:$true] %s2130_s16 }
  0x1a   : > { %v334_v6 = vld [vmem:[%s2529_s29 + $0x18] sm:$0xff]  ;;  %410 = vst.msk [vmem:[#allocation2 + $0x28] sm:$0xff] %vm366_vm1, %v331_v3  ;;  %v341_v44 = vld [vmem:[%s2529_s29 + $0x50] sm:$0xff]  ;;  %v343_v47 = vld [vmem:[%s2529_s29 + $0x60] sm:$0xff]  ;;  %s2129_s14 = scalar_lea.hbm %s3829_s9, %s2297_s27  ;;  %s2118_s21 = scalar_lea.sflag [#allocation5], %s323_s22 }
  0x1b   : > { %411 = vst.msk [vmem:[#allocation2 + $0x30] sm:$0xff] %vm366_vm1, %v332_v4  ;;  %v342_v45 = vld [vmem:[%s2529_s29 + $0x58] sm:$0xff]  ;;  %v344_v48 = vld [vmem:[%s2529_s29 + $0x68] sm:$0xff]  ;;  %v345_v52 = vld [vmem:[%s2529_s29 + $0x70] sm:$0xff]  ;;  %s2132_s17 = sshll.u32 %s2129_s14, 4  ;;  %s2367_s27 = scalar_lea.hbm %s3829_s9, 128  ;;  %s2133_s17 = int_to_ptr.hbm [resolvable:$true] %s2132_s17 }
  0x1c   : > { %412 = vst.msk [vmem:[#allocation2 + $0x48] sm:$0xff] %vm366_vm1, %v333_v5  ;;  %v442_v10 = vld [vmem:[#allocation2 + $0x7] sm:$0xff]  ;;  %v346_v53 = vld [vmem:[%s2529_s29 + $0x78] sm:$0xff]  ;;  %s2361_s23 = sshra.s32 %s2133_s17, 4  ;;  %s2362_s23 = int_to_ptr.hbm [resolvable:$true] %s2361_s23 }
  0x1d   : > { %413 = vst.msk [vmem:[#allocation2 + $0x50] sm:$0xff] %vm366_vm1, %v334_v6  ;;  %v539_v11 = vld [vmem:[#allocation2 + $0x8] sm:$0xff]  ;;  %v475_v12 = vmul.f32 %v2540_v7, %v442_v10  ;;  %v540_v50 = vld [vmem:[#allocation2 + $0x10] sm:$0xff]  ;;  %s2363_s13 = scalar_lea.hbm %s2362_s23, 64  ;;  %p2368_p0 = scmp.lt.s32.totalorder %s2362_s23, %s3829_s9 }
  0x1e   : > { %v572_v13 = vmul.f32 %v2542_v8, %v539_v11  ;;  %v636_v14 = vld [vmem:[#allocation2 + $0x9] sm:$0xff]  ;;  %374 = vst.msk [vmem:[#allocation2 + $0x228] sm:$0xff] %vm366_vm1, %v3833_v1  ;;  %v573_v55 = vmul.f32 %v2542_v8, %v540_v50  ;;  %p2364_p11 = scmp.ne.s32.totalorder %s2362_s23, %s2363_s13  ;;  %p2369_p1 = scmp.lt.s32.totalorder %s2367_s27, %s2363_s13 }
  0x1f   : > { %v669_v17 = vmul.f32 %v2545_v9, %v636_v14  ;;  %375 = vst.msk [vmem:[#allocation2 + $0x230] sm:$0xff] %vm366_vm1, %v3833_v1  ;;  %v443_v49 = vld [vmem:[#allocation2 + $0xf] sm:$0xff] }
  0x20   : > { %v604_v18 = vadd.f32 %v572_v13, %v475_v12  ;;  %380 = vst.msk [vmem:[#allocation2 + $0x60] sm:$0xff] %vm366_vm1, %v3833_v1  ;;  %v476_v54 = vmul.f32 %v2540_v7, %v443_v49  ;;  %p2365_p12 = pnand %p2364_p11, %p2502_p5  ;;  %p2370_p2 = por %p2369_p1, %p2368_p0 }
  0x21   : > { %v2564_v20 = vld [vmem:[#allocation2 + $0x27] sm:$0xff]  ;;  %381 = vst.msk [vmem:[#allocation2 + $0x80] sm:$0xff] %vm366_vm1, %v3833_v1 }
  0x22   : > { %v2566_v21 = vld [vmem:[#allocation2 + $0x28] sm:$0xff]  ;;  %v701_v22 = vadd.f32 %v669_v17, %v604_v18  ;;  %v766_v23 = vmul.f32 %v2551_v15, %v2564_v20  ;;  %382 = vst.msk [vmem:[#allocation2 + $0xa0] sm:$0xff] %vm366_vm1, %v3833_v1  ;;  %v2648_v57 = vld [vmem:[#allocation2 + $0x30] sm:$0xff]  ;;  %v605_v61 = vadd.f32 %v573_v55, %v476_v54  ;;  %v477_v39 = vmul.f32 %v2564_v20, %v2540_v7  ;;  %p2366_p13 = pneg %p2365_p12 }
  0x23   : > { %v863_v24 = vmul.f32 %v2553_v16, %v2566_v21  ;;  %v2574_v25 = vld [vmem:[#allocation2 + $0x29] sm:$0xff]  ;;  %383 = vst.msk [vmem:[#allocation2 + $0xc0] sm:$0xff] %vm366_vm1, %v3833_v1  ;;  %v2666_v4 = vmul.f32 %v2553_v16, %v2648_v57  ;;  %v574_v49 = vmul.f32 %v2566_v21, %v2542_v8 }
  0x24   : > { %v2583_v28 = vld [vmem:[#allocation2 + $0x47] sm:$0xff]  ;;  %v798_v29 = vadd.f32 %v766_v23, %v701_v22  ;;  %v960_v30 = vmul.f32 %v2560_v19, %v2574_v25  ;;  %384 = vst.msk [vmem:[#allocation2 + $0xe0] sm:$0xff] %vm366_vm1, %v3833_v1  ;;  %v2646_v56 = vld [vmem:[#allocation2 + $0x2f] sm:$0xff]  ;;  %v671_v50 = vmul.f32 %v2574_v25, %v2545_v9  ;;  %p2371_p3 = pnand %p2370_p2, %p2366_p13 }
  0x25   : > { %v2593_v32 = vld [vmem:[#allocation2 + $0x48] sm:$0xff]  ;;  %v1058_v34 = vmul.f32 %v2576_v26, %v2583_v28  ;;  %385 = vst.msk [vmem:[#allocation2 + $0x100] sm:$0xff] %vm366_vm1, %v3833_v1  ;;  %v2656_v62 = vld [vmem:[#allocation2 + $0x50] sm:$0xff]  ;;  %v767_v3 = vmul.f32 %v2551_v15, %v2646_v56 }
  0x26   : > { %v895_v33 = vadd.f32 %v863_v24, %v798_v29  ;;  %v2603_v36 = vld [vmem:[#allocation2 + $0x49] sm:$0xff]  ;;  %386 = vst.msk [vmem:[#allocation2 + $0x120] sm:$0xff] %vm366_vm1, %v3833_v1  ;;  %v1155_v38 = vmul.f32 %v2589_v31, %v2593_v32  ;;  %v2683_v24 = vmul.f32 %v2589_v31, %v2656_v62 }
  0x27   : > { %3859 = vst [vmem:[#allocation7_spill] sm:$0xff] %v2603_v36  ;;  %v1252_v41 = vmul.f32 %v2599_v35, %v2603_v36  ;;  %v2652_v58 = vld [vmem:[#allocation2 + $0x4f] sm:$0xff] }
  0x28   : > { %v992_v37 = vadd.f32 %v960_v30, %v895_v33  ;;  %387 = vst.msk [vmem:[#allocation2 + $0x140] sm:$0xff] %vm366_vm1, %v3833_v1  ;;  %v2673_v13 = vmul.f32 %v2576_v26, %v2652_v58 }
  0x29   : > { %388 = vst.msk [vmem:[#allocation2 + $0x160] sm:$0xff] %vm366_vm1, %v3833_v1 }
  0x2a   : > { %v1090_v40 = vadd.f32 %v1058_v34, %v992_v37  ;;  %389 = vst.msk [vmem:[#allocation2 + $0x180] sm:$0xff] %vm366_vm1, %v3833_v1 }
  0x2b   : > { %390 = vst.msk [vmem:[#allocation2 + $0x1a0] sm:$0xff] %vm366_vm1, %v3833_v1 }
  0x2c   : > { %v1187_v42 = vadd.f32 %v1155_v38, %v1090_v40  ;;  %391 = vst.msk [vmem:[#allocation2 + $0x1c0] sm:$0xff] %vm366_vm1, %v3833_v1 }
  0x2d   : > { %392 = vst.msk [vmem:[#allocation2 + $0x1e0] sm:$0xff] %vm366_vm1, %v3833_v1 }
  0x2e   : > { %v1284_v46 = vadd.f32 %v1252_v41, %v1187_v42  ;;  %393 = vst.msk [vmem:[#allocation2 + $0x200] sm:$0xff] %vm366_vm1, %v3833_v1 }
  0x2f   : > { %420 = vst.msk [vmem:[#allocation2 + $0xc8] sm:$0xff] %vm366_vm1, %v341_v44 }
  0x30   : > { %v1319_v51 = vadd.f32 %v2622_v43, %v1284_v46  ;;  %421 = vst.msk [vmem:[#allocation2 + $0xd0] sm:$0xff] %vm366_vm1, %v342_v45 }
  0x31   : > { %422 = vst.msk [vmem:[#allocation2 + $0xe8] sm:$0xff] %vm366_vm1, %v343_v47 }
  0x32   : > { %2251 = vmatmul.msk.f32.vlgmr.msra.gmra.mxu0 %vm366_vm1, %v1319_v51  ;;  %423 = vst.msk [vmem:[#allocation2 + $0xf0] sm:$0xff] %vm366_vm1, %v344_v48 }
  0x33   : > { %424 = vst.msk [vmem:[#allocation2 + $0x108] sm:$0xff] %vm366_vm1, %v345_v52 }
  0x34   : > { %425 = vst.msk [vmem:[#allocation2 + $0x110] sm:$0xff] %vm366_vm1, %v346_v53 }
  0x35   : > { %371 = vst.msk [vmem:[#allocation2 + $0x18] sm:$0x1] %vm370_vm2, %v3833_v1 }
  0x36   : > { %3860 = vst [vmem:[#allocation8_spill] sm:$0xff] %v2652_v58  ;;  %v454_v59 = vld [vmem:[#allocation2 + $0xc7] sm:$0xff] }
  0x37   : > { %v551_v60 = vld [vmem:[#allocation2 + $0xc8] sm:$0xff]  ;;  %394 = vst.msk [vmem:[#allocation2 + $0x38] sm:$0x1] %vm370_vm2, %v3833_v1  ;;  %v487_v63 = vmul.f32 %v2540_v7, %v454_v59  ;;  %v2668_v6 = vld [vmem:[#allocation2 + $0xd0] sm:$0xff]  ;;  %v2688_v27 = vmul.f32 %v2551_v15, %v454_v59 }
  0x38   : > { %3861 = vst [vmem:[#allocation9_spill] sm:$0xff] %v2656_v62  ;;  %v584_v0 = vmul.f32 %v2542_v8, %v551_v60  ;;  %v648_v2 = vld [vmem:[#allocation2 + $0xc9] sm:$0xff]  ;;  %v585_v17 = vmul.f32 %v2542_v8, %v2668_v6  ;;  %v2700_v37 = vmul.f32 %v2553_v16, %v551_v60  ;;  %v606_v60 = vadd.f32 %v574_v49, %v477_v39 }
  0x39   : > { %395 = vst.msk [vmem:[#allocation2 + $0x58] sm:$0x1] %vm370_vm2, %v3833_v1  ;;  %v455_v5 = vld [vmem:[#allocation2 + $0xcf] sm:$0xff]  ;;  %v681_v10 = vmul.f32 %v2545_v9, %v648_v2  ;;  %v745_v11 = vld [vmem:[#allocation2 + $0xe7] sm:$0xff]  ;;  %v2703_v38 = vmul.f32 %v2560_v19, %v648_v2 }
  0x3a   : > { %v842_v12 = vld [vmem:[#allocation2 + $0xe8] sm:$0xff]  ;;  %376 = vst.msk [vmem:[#allocation2 + $0x238] sm:$0x1] %vm370_vm2, %v3833_v1  ;;  %v488_v14 = vmul.f32 %v2540_v7, %v455_v5  ;;  %v616_v18 = vadd.f32 %v584_v0, %v487_v63  ;;  %v778_v22 = vmul.f32 %v2551_v15, %v745_v11  ;;  %v2713_v44 = vmul.f32 %v2576_v26, %v745_v11  ;;  %v2725_v48 = vld [vmem:[#allocation2 + $0xf0] sm:$0xff] }
  0x3b   : > { %v939_v23 = vld [vmem:[#allocation2 + $0xe9] sm:$0xff]  ;;  %396 = vst.msk [vmem:[#allocation2 + $0x78] sm:$0x1] %vm370_vm2, %v3833_v1  ;;  %v875_v30 = vmul.f32 %v2553_v16, %v842_v12  ;;  %v2739_v55 = vmul.f32 %v2589_v31, %v842_v12  ;;  %v768_v63 = vmul.f32 %v2583_v28, %v2551_v15  ;;  %v489_v0 = vmul.f32 %v745_v11, %v2540_v7 }
  0x3c   : > { %v2690_v29 = vld [vmem:[#allocation2 + $0xef] sm:$0xff]  ;;  %v2693_v33 = vld [vmem:[#allocation2 + $0x107] sm:$0xff]  ;;  %397 = vst.msk [vmem:[#allocation2 + $0x98] sm:$0x1] %vm370_vm2, %v3833_v1  ;;  %v713_v40 = vadd.f32 %v681_v10, %v616_v18  ;;  %v972_v41 = vmul.f32 %v2560_v19, %v939_v23  ;;  %v2715_v45 = vadd.f32 %v585_v17, %v488_v14  ;;  %v2755_v14 = vmul.f32 %v2599_v35, %v939_v23 }
  0x3d   : > { %3862 = vst [vmem:[#allocation10_spill] sm:$0xff] %v2693_v33  ;;  %v2695_v34 = vld [vmem:[#allocation2 + $0x108] sm:$0xff]  ;;  %v1070_v46 = vmul.f32 %v2576_v26, %v2693_v33  ;;  %v637_v47 = vld [vmem:[#allocation2 + $0x11] sm:$0xff]  ;;  %v2723_v20 = vmul.f32 %v2551_v15, %v2690_v29  ;;  %v2759_v17 = vmul.f32 %v2553_v16, %v2725_v48  ;;  %v2766_v11 = vmul.f32 %v2551_v15, %v455_v5 }
  0x3e   : > { %3863 = vst [vmem:[#allocation11_spill] sm:$0xff] %v2695_v34  ;;  %v2708_v42 = vld [vmem:[#allocation2 + $0x109] sm:$0xff]  ;;  %v810_v51 = vadd.f32 %v778_v22, %v713_v40  ;;  %v1167_v52 = vmul.f32 %v2589_v31, %v2695_v34  ;;  %v670_v53 = vmul.f32 %v2545_v9, %v637_v47  ;;  %v2734_v54 = vld [vmem:[#allocation2 + $0x31] sm:$0xff]  ;;  %v703_v22 = vadd.f32 %v671_v50, %v606_v60 }
  0x3f   : > { %3864 = vst [vmem:[#allocation12_spill] sm:$0xff] %v2708_v42  ;;  %v1264_v21 = vmul.f32 %v2599_v35, %v2708_v42  ;;  %v2747_v25 = vld [vmem:[#allocation2 + $0x10f] sm:$0xff]  ;;  %v961_v18 = vmul.f32 %v2560_v19, %v2734_v54  ;;  %v2789_v60 = vmul.f32 %v2553_v16, %v2668_v6  ;;  %v962_v6 = vmul.f32 %v2603_v36, %v2560_v19 }
  0x40   : > { %398 = vst.msk [vmem:[#allocation2 + $0xb8] sm:$0x1] %vm370_vm2, %v3833_v1  ;;  %v2743_v59 = vld [vmem:[#allocation2 + $0x51] sm:$0xff]  ;;  %v907_v2 = vadd.f32 %v875_v30, %v810_v51  ;;  %v702_v10 = vadd.f32 %v670_v53, %v605_v61  ;;  %v586_v61 = vmul.f32 %v842_v12, %v2542_v8  ;;  %v2775_v47 = vmul.f32 %v2576_v26, %v2747_v25 }
  0x41   : > { %399 = vst.msk [vmem:[#allocation2 + $0xd8] sm:$0x1] %vm370_vm2, %v3833_v1  ;;  %v1253_v40 = vmul.f32 %v2599_v35, %v2743_v59  ;;  %v2777_v49 = vld [vmem:[#allocation2 + $0x110] sm:$0xff]  ;;  %v800_v5 = vadd.f32 %v768_v63, %v703_v22  ;;  %v780_v63 = vmul.f32 %v2693_v33, %v2551_v15  ;;  %v351_v33 = vld [vmem:[%s2529_s29 + $0xa0] sm:$0xff] }
  0x42   : > { %400 = vst.msk [vmem:[#allocation2 + $0xf8] sm:$0x1] %vm370_vm2, %v3833_v1  ;;  %v1004_v30 = vadd.f32 %v972_v41, %v907_v2  ;;  %v799_v39 = vadd.f32 %v767_v3, %v702_v10  ;;  %v865_v3 = vmul.f32 %v2593_v32, %v2553_v16  ;;  %v618_v12 = vadd.f32 %v586_v61, %v489_v0  ;;  %v340_v61 = vld [vmem:[%s2529_s29 + $0x48] sm:$0xff] }
  0x43   : > { %3865 = vst [vmem:[#allocation13_spill] sm:$0xff] %v2743_v59  ;;  %v683_v41 = vmul.f32 %v939_v23, %v2545_v9  ;;  %v339_v23 = vld [vmem:[%s2529_s29 + $0x40] sm:$0xff] }
  0x44   : > { %401 = vst.msk [vmem:[#allocation2 + $0x118] sm:$0x1] %vm370_vm2, %v3833_v1  ;;  %v1102_v50 = vadd.f32 %v1070_v46, %v1004_v30  ;;  %v896_v51 = vadd.f32 %v2666_v4, %v799_v39  ;;  %v2801_v4 = vmul.f32 %v2589_v31, %v2777_v49  ;;  %v2810_v30 = vmul.f32 %v2576_v26, %v2690_v29 }
  0x45   : > { %3866 = vst [vmem:[#allocation14_spill] sm:$0xff] %v2747_v25  ;;  %v715_v2 = vadd.f32 %v683_v41, %v618_v12  ;;  %v877_v39 = vmul.f32 %v2695_v34, %v2553_v16  ;;  %v352_v34 = vld [vmem:[%s2529_s29 + $0xa8] sm:$0xff] }
  0x46   : > { %402 = vst.msk [vmem:[#allocation2 + $0x138] sm:$0x1] %vm370_vm2, %v3833_v1  ;;  %v1199_v10 = vadd.f32 %v1167_v52, %v1102_v50  ;;  %v993_v22 = vadd.f32 %v961_v18, %v896_v51  ;;  %v897_v18 = vadd.f32 %v865_v3, %v800_v5  ;;  %v353_v5 = vld [vmem:[%s2529_s29 + $0xb0] sm:$0xff] }
  0x47   : > { %403 = vst.msk [vmem:[#allocation2 + $0x158] sm:$0x1] %vm370_vm2, %v3833_v1 }
  0x48   : > { %404 = vst.msk [vmem:[#allocation2 + $0x178] sm:$0x1] %vm370_vm2, %v3833_v1  ;;  %v649_v53 = vld [vmem:[#allocation2 + $0xd1] sm:$0xff]  ;;  %v1296_v50 = vadd.f32 %v1264_v21, %v1199_v10  ;;  %v1091_v51 = vadd.f32 %v2673_v13, %v993_v22  ;;  %v478_v21 = vmul.f32 %v2646_v56, %v2540_v7  ;;  %v575_v13 = vmul.f32 %v2648_v57, %v2542_v8  ;;  %v355_v56 = vld [vmem:[%s2529_s29 + $0xc0] sm:$0xff] }
  0x49   : > { %405 = vst.msk [vmem:[#allocation2 + $0x198] sm:$0x1] %vm370_vm2, %v3833_v1  ;;  %v682_v46 = vmul.f32 %v2545_v9, %v649_v53  ;;  %v2797_v0 = vld [vmem:[#allocation2 + $0xf1] sm:$0xff]  ;;  %v2821_v41 = vmul.f32 %v2560_v19, %v649_v53  ;;  %v672_v53 = vmul.f32 %v2734_v54, %v2545_v9  ;;  %v2852_v22 = vadd.f32 %v962_v6, %v897_v18 }
  0x4a   : > { %406 = vst.msk [vmem:[#allocation2 + $0x1b8] sm:$0x1] %vm370_vm2, %v3833_v1  ;;  %v973_v52 = vmul.f32 %v2560_v19, %v2797_v0  ;;  %v1188_v10 = vadd.f32 %v2683_v24, %v1091_v51  ;;  %v607_v24 = vadd.f32 %v575_v13, %v478_v21  ;;  %v2867_v18 = vmul.f32 %v2656_v62, %v2553_v16  ;;  %v336_v51 = vld [vmem:[%s2529_s29 + $0x28] sm:$0xff] }
  0x4b   : > { %407 = vst.msk [vmem:[#allocation2 + $0x1d8] sm:$0x1] %vm370_vm2, %v3833_v1  ;;  %v714_v12 = vadd.f32 %v682_v46, %v2715_v45  ;;  %v2826_v36 = vld [vmem:[#allocation2 + $0x111] sm:$0xff]  ;;  %v2830_v45 = vmul.f32 %v2589_v31, %v2725_v48  ;;  %v812_v46 = vadd.f32 %v780_v63, %v715_v2  ;;  %v587_v21 = vmul.f32 %v2725_v48, %v2542_v8 }
  0x4c   : > { %408 = vst.msk [vmem:[#allocation2 + $0x1f8] sm:$0x1] %vm370_vm2, %v3833_v1  ;;  %v354_v63 = vld [vmem:[%s2529_s29 + $0xb8] sm:$0xff]  ;;  %v1265_v54 = vmul.f32 %v2599_v35, %v2826_v36  ;;  %v2901_v48 = vmul.f32 %v2583_v28, %v2540_v7 }
  0x4d   : > { %409 = vst.msk [vmem:[#allocation2 + $0x218] sm:$0x1] %vm370_vm2, %v3833_v1  ;;  %v811_v3 = vadd.f32 %v2723_v20, %v714_v12  ;;  %v909_v2 = vadd.f32 %v877_v39, %v812_v46  ;;  %v974_v20 = vmul.f32 %v2708_v42, %v2560_v19  ;;  %v335_v39 = vld [vmem:[%s2529_s29 + $0x20] sm:$0xff]  ;;  %v704_v12 = vadd.f32 %v672_v53, %v607_v24  ;;  %v358_v28 = vld [vmem:[%s2529_s29 + $0xd8] sm:$0xff] }
  0x4e   : > { %418 = vst.msk [vmem:[#allocation2 + $0xa8] sm:$0xff] %vm366_vm1, %v339_v23  ;;  %v1331_v23 = vadd.f32 %v2622_v43, %v1296_v50  ;;  %v347_v46 = vld [vmem:[%s2529_s29 + $0x80] sm:$0xff] }
  0x4f   : > { %419 = vst.msk [vmem:[#allocation2 + $0xb0] sm:$0xff] %vm366_vm1, %v340_v61  ;;  %v908_v57 = vadd.f32 %v2759_v17, %v811_v3  ;;  %v356_v61 = vld [vmem:[%s2529_s29 + $0xc8] sm:$0xff]  ;;  %v769_v17 = vmul.f32 %v2652_v58, %v2551_v15  ;;  %v2878_v3 = vadd.f32 %v974_v20, %v909_v2 }
  0x50   : > { %430 = vst.msk [vmem:[#allocation2 + $0x168] sm:$0xff] %vm366_vm1, %v351_v33  ;;  %2263 = vmatmul.msk.f32.vlgmr.msra.gmra.mxu2 %vm366_vm1, %v1331_v23  ;;  %v1285_v33 = vadd.f32 %v1253_v40, %v1188_v10  ;;  %v2871_v40 = vmul.f32 %v2743_v59, %v2560_v19  ;;  %v357_v10 = vld [vmem:[%s2529_s29 + $0xd0] sm:$0xff] }
  0x51   : > { %431 = vst.msk [vmem:[#allocation2 + $0x170] sm:$0xff] %vm366_vm1, %v352_v34  ;;  %v2859_v34 = vmul.f32 %v2599_v35, %v2797_v0  ;;  %v1005_v6 = vadd.f32 %v973_v52, %v908_v57  ;;  %v490_v52 = vmul.f32 %v2690_v29, %v2540_v7  ;;  %v2897_v29 = vmul.f32 %v2747_v25, %v2551_v15 }
  0x52   : > { %432 = vst.msk [vmem:[#allocation2 + $0x188] sm:$0xff] %vm366_vm1, %v353_v5  ;;  %v1320_v50 = vadd.f32 %v2622_v43, %v1285_v33  ;;  %v348_v5 = vld [vmem:[%s2529_s29 + $0x88] sm:$0xff]  ;;  %v2915_v57 = vadd.f32 %v769_v17, %v704_v12 }
  0x53   : > { %433 = vst.msk [vmem:[#allocation2 + $0x190] sm:$0xff] %vm366_vm1, %v354_v63  ;;  %v1103_v23 = vadd.f32 %v2775_v47, %v1005_v6  ;;  %v2893_v63 = vmul.f32 %v2797_v0, %v2545_v9  ;;  %v2953_v62 = vadd.f32 %v587_v21, %v490_v52 }
  0x54   : > { %434 = vst.msk [vmem:[#allocation2 + $0x1a8] sm:$0xff] %vm366_vm1, %v355_v56  ;;  %2252 = vmatmul.msk.f32.gmra.mxu0 %vm366_vm1, %v1320_v50 }
  0x55   : > { %v2884_v13 = vld [vmem:[#allocation2 + $0xa7] sm:$0xff]  ;;  %435 = vst.msk [vmem:[#allocation2 + $0x1b0] sm:$0xff] %vm366_vm1, %v356_v61  ;;  %v1200_v6 = vadd.f32 %v2801_v4, %v1103_v23 }
  0x56   : > { %3867 = vst [vmem:[#allocation15_spill] sm:$0xff] %v2884_v13  ;;  %v2886_v53 = vld [vmem:[#allocation2 + $0xa8] sm:$0xff]  ;;  %v485_v2 = vmul.f32 %v2540_v7, %v2884_v13  ;;  %v2913_v56 = vld [vmem:[#allocation2 + $0xb0] sm:$0xff] }
  0x57   : > { %3868 = vst [vmem:[#allocation16_spill] sm:$0xff] %v2886_v53  ;;  %v582_v47 = vmul.f32 %v2542_v8, %v2886_v53  ;;  %v2908_v20 = vld [vmem:[#allocation2 + $0xa9] sm:$0xff]  ;;  %v2926_v1 = vld [vmem:[#allocation2 + $0xb1] sm:$0xff] }
  0x58   : > { %3869 = vst [vmem:[#allocation17_spill] sm:$0xff] %v2908_v20  ;;  %v2911_v0 = vld [vmem:[#allocation2 + $0xaf] sm:$0xff]  ;;  %v679_v24 = vmul.f32 %v2545_v9, %v2908_v20  ;;  %v464_v33 = vld [vmem:[#allocation2 + $0x167] sm:$0xff]  ;;  %v680_v4 = vmul.f32 %v2545_v9, %v2926_v1 }
  0x59   : > { %414 = vst.msk [vmem:[#allocation2 + $0x68] sm:$0xff] %vm366_vm1, %v335_v39  ;;  %v561_v61 = vld [vmem:[#allocation2 + $0x168] sm:$0xff]  ;;  %v486_v50 = vmul.f32 %v2540_v7, %v2911_v0  ;;  %v583_v39 = vmul.f32 %v2542_v8, %v2913_v56  ;;  %v614_v17 = vadd.f32 %v582_v47, %v485_v2  ;;  %v497_v12 = vmul.f32 %v2540_v7, %v464_v33 }
  0x5a   : > { %3870 = vst [vmem:[#allocation18_spill] sm:$0xff] %v2911_v0  ;;  %v594_v20 = vmul.f32 %v2542_v8, %v561_v61  ;;  %v658_v53 = vld [vmem:[#allocation2 + $0x169] sm:$0xff]  ;;  %v1297_v2 = vadd.f32 %v1265_v54, %v1200_v6 }
  0x5b   : > { %3871 = vst [vmem:[#allocation19_spill] sm:$0xff] %v2913_v56  ;;  %v2932_v23 = vld [vmem:[#allocation2 + $0x16f] sm:$0xff]  ;;  %v691_v56 = vmul.f32 %v2545_v9, %v658_v53  ;;  %v2938_v0 = vld [vmem:[#allocation2 + $0x187] sm:$0xff]  ;;  %v615_v47 = vadd.f32 %v583_v39, %v486_v50 }
  0x5c   : > { %415 = vst.msk [vmem:[#allocation2 + $0x70] sm:$0xff] %vm366_vm1, %v336_v51  ;;  %v2934_v51 = vld [vmem:[#allocation2 + $0x170] sm:$0xff]  ;;  %v2940_v13 = vld [vmem:[#allocation2 + $0x188] sm:$0xff]  ;;  %v498_v33 = vmul.f32 %v2540_v7, %v2932_v23  ;;  %v626_v25 = vadd.f32 %v594_v20, %v497_v12  ;;  %v788_v59 = vmul.f32 %v2551_v15, %v2938_v0  ;;  %v1332_v20 = vadd.f32 %v2622_v43, %v1297_v2 }
  0x5d   : > { %3872 = vst [vmem:[#allocation20_spill] sm:$0xff] %v2926_v1  ;;  %v337_v61 = vld [vmem:[%s2529_s29 + $0x30] sm:$0xff]  ;;  %v711_v1 = vadd.f32 %v679_v24, %v614_v17  ;;  %v885_v54 = vmul.f32 %v2553_v16, %v2940_v13  ;;  %v2957_v6 = vld [vmem:[#allocation2 + $0x1a7] sm:$0xff]  ;;  %v712_v24 = vadd.f32 %v680_v4, %v615_v47  ;;  %v595_v50 = vmul.f32 %v2542_v8, %v2934_v51 }
  0x5e   : > { %3873 = vst [vmem:[#allocation21_spill] sm:$0xff] %v2932_v23  ;;  %v2950_v53 = vld [vmem:[#allocation2 + $0x171] sm:$0xff]  ;;  %v1080_v21 = vmul.f32 %v2576_v26, %v2957_v6  ;;  %2264 = vmatmul.msk.f32.gmra.mxu2 %vm366_vm1, %v1332_v20 }
  0x5f   : > { %3874 = vst [vmem:[#allocation22_spill] sm:$0xff] %v2934_v51  ;;  %v808_v39 = vadd.f32 %v2688_v27, %v711_v1  ;;  %v2970_v17 = vld [vmem:[#allocation2 + $0x18f] sm:$0xff]  ;;  %v809_v1 = vadd.f32 %v2766_v11, %v712_v24  ;;  %v627_v27 = vadd.f32 %v595_v50, %v498_v33 }
  0x60   : > { %426 = vst.msk [vmem:[#allocation2 + $0x128] sm:$0xff] %vm366_vm1, %v347_v46  ;;  %v2948_v46 = vld [vmem:[#allocation2 + $0x189] sm:$0xff]  ;;  %v2994_v11 = vld [vmem:[#allocation2 + $0x191] sm:$0xff] }
  0x61   : > { %427 = vst.msk [vmem:[#allocation2 + $0x130] sm:$0xff] %vm366_vm1, %v348_v5  ;;  %v2959_v5 = vld [vmem:[#allocation2 + $0x1a8] sm:$0xff]  ;;  %v982_v52 = vmul.f32 %v2560_v19, %v2948_v46  ;;  %v905_v2 = vadd.f32 %v2700_v37, %v808_v39  ;;  %v906_v24 = vadd.f32 %v2789_v60, %v809_v1  ;;  %v789_v37 = vmul.f32 %v2551_v15, %v2970_v17  ;;  %v3007_v42 = vld [vmem:[#allocation2 + $0x1b0] sm:$0xff] }
  0x62   : > { %3875 = vst [vmem:[#allocation23_spill] sm:$0xff] %v2950_v53  ;;  %v1177_v12 = vmul.f32 %v2589_v31, %v2959_v5  ;;  %v2976_v4 = vld [vmem:[#allocation2 + $0x67] sm:$0xff] }
  0x63   : > { %436 = vst.msk [vmem:[#allocation2 + $0x1c8] sm:$0xff] %vm366_vm1, %v357_v10  ;;  %v723_v10 = vadd.f32 %v691_v56, %v626_v25  ;;  %v692_v25 = vmul.f32 %v2545_v9, %v2950_v53  ;;  %v2983_v56 = vld [vmem:[#allocation2 + $0x190] sm:$0xff]  ;;  %v1060_v20 = vmul.f32 %v2576_v26, %v2976_v4  ;;  %v1002_v39 = vadd.f32 %v2703_v38, %v905_v2 }
  0x64   : > { %437 = vst.msk [vmem:[#allocation2 + $0x1d0] sm:$0xff] %vm366_vm1, %v358_v28  ;;  %v2978_v28 = vld [vmem:[#allocation2 + $0x68] sm:$0xff]  ;;  %v886_v58 = vmul.f32 %v2553_v16, %v2983_v56  ;;  %v1003_v1 = vadd.f32 %v2821_v41, %v906_v24  ;;  %v983_v38 = vmul.f32 %v2560_v19, %v2994_v11 }
  0x65   : > { %416 = vst.msk [vmem:[#allocation2 + $0x88] sm:$0xff] %vm366_vm1, %v337_v61  ;;  %v820_v47 = vadd.f32 %v788_v59, %v723_v10  ;;  %v2986_v61 = vld [vmem:[#allocation2 + $0x1a9] sm:$0xff]  ;;  %v1157_v51 = vmul.f32 %v2589_v31, %v2978_v28  ;;  %v724_v50 = vadd.f32 %v692_v25, %v627_v27  ;;  %v1092_v53 = vadd.f32 %v1060_v20, %v2852_v22 }
  0x66   : > { %3876 = vst [vmem:[#allocation24_spill] sm:$0xff] %v2983_v56  ;;  %v2992_v23 = vld [vmem:[#allocation2 + $0x69] sm:$0xff]  ;;  %v1274_v60 = vmul.f32 %v2599_v35, %v2986_v61  ;;  %v1100_v22 = vadd.f32 %v2713_v44, %v1002_v39  ;;  %v338_v56 = vld [vmem:[%s2529_s29 + $0x38] sm:$0xff]  ;;  %v1101_v41 = vadd.f32 %v2810_v30, %v1003_v1 }
  0x67   : > { %3877 = vst [vmem:[#allocation25_spill] sm:$0xff] %v2992_v23  ;;  %v1254_v33 = vmul.f32 %v2599_v35, %v2992_v23  ;;  %v3001_v59 = vld [vmem:[#allocation2 + $0x1af] sm:$0xff]  ;;  %v917_v10 = vadd.f32 %v885_v54, %v820_v47  ;;  %v3009_v23 = vld [vmem:[#allocation2 + $0x127] sm:$0xff]  ;;  %v821_v27 = vadd.f32 %v789_v37, %v724_v50  ;;  %v1189_v2 = vadd.f32 %v1157_v51, %v1092_v53 }
  0x68   : > { %3878 = vst [vmem:[#allocation26_spill] sm:$0xff] %v3007_v42  ;;  %v3016_v25 = vld [vmem:[#allocation2 + $0x128] sm:$0xff]  ;;  %v1081_v47 = vmul.f32 %v2576_v26, %v3001_v59  ;;  %v1178_v50 = vmul.f32 %v2589_v31, %v3007_v42  ;;  %v3027_v37 = vld [vmem:[#allocation2 + $0x1b1] sm:$0xff]  ;;  %v1072_v44 = vmul.f32 %v2576_v26, %v3009_v23  ;;  %v1197_v51 = vadd.f32 %v2739_v55, %v1100_v22  ;;  %v359_v55 = vld [vmem:[%s2529_s29 + $0xe0] sm:$0xff] }
  0x69   : > { %3879 = vst [vmem:[#allocation27_spill] sm:$0xff] %v3009_v23  ;;  %v1014_v54 = vadd.f32 %v982_v52, %v917_v10  ;;  %v3021_v20 = vld [vmem:[#allocation2 + $0x129] sm:$0xff]  ;;  %v918_v24 = vadd.f32 %v886_v58, %v821_v27  ;;  %v1286_v52 = vadd.f32 %v1254_v33, %v1189_v2  ;;  %v1169_v39 = vmul.f32 %v2589_v31, %v3016_v25  ;;  %v350_v10 = vld [vmem:[%s2529_s29 + $0x98] sm:$0xff] }
  0x6a   : > { %417 = vst.msk [vmem:[#allocation2 + $0x90] sm:$0xff] %vm366_vm1, %v338_v56  ;;  %v3035_v30 = vld [vmem:[#allocation2 + $0x6f] sm:$0xff]  ;;  %v1198_v1 = vadd.f32 %v2830_v45, %v1101_v41  ;;  %v1104_v42 = vadd.f32 %v1072_v44, %v2878_v3  ;;  %v1266_v56 = vmul.f32 %v2599_v35, %v3021_v20  ;;  %v1275_v2 = vmul.f32 %v2599_v35, %v3027_v37 }
  0x6b   : > { %v1112_v53 = vadd.f32 %v1080_v21, %v1014_v54  ;;  %v349_v58 = vld [vmem:[%s2529_s29 + $0x90] sm:$0xff]  ;;  %v1015_v27 = vadd.f32 %v983_v38, %v918_v24  ;;  %v1294_v21 = vadd.f32 %v2755_v14, %v1197_v51  ;;  %v1321_v22 = vadd.f32 %v2622_v43, %v1286_v52  ;;  %429 = vst.msk [vmem:[#allocation2 + $0x150] sm:$0xff] %vm366_vm1, %v350_v10  ;;  %v360_v3 = vld [vmem:[%s2529_s29 + $0xe8] sm:$0xff] }
  0x6c   : > { %v3043_v23 = vld [vmem:[#allocation2 + $0x70] sm:$0xff]  ;;  %428 = vst.msk [vmem:[#allocation2 + $0x148] sm:$0xff] %vm366_vm1, %v349_v58  ;;  %v898_v54 = vadd.f32 %v2867_v18, %v2915_v57  ;;  %v1201_v41 = vadd.f32 %v1169_v39, %v1104_v42  ;;  %v1061_v24 = vmul.f32 %v2576_v26, %v3035_v30  ;;  %v596_v52 = vmul.f32 %v2940_v13, %v2542_v8 }
  0x6d   : > { %v1209_v33 = vadd.f32 %v1177_v12, %v1112_v53  ;;  %v3051_v45 = vld [vmem:[#allocation2 + $0x71] sm:$0xff]  ;;  %v1113_v38 = vadd.f32 %v1081_v47, %v1015_v27  ;;  %438 = vst.msk [vmem:[#allocation2 + $0x1e8] sm:$0xff] %vm366_vm1, %v359_v55  ;;  %v1329_v14 = vadd.f32 %v2622_v43, %v1294_v21  ;;  %2253 = vmatmul.msk.f32.gmra.mxu0 %vm366_vm1, %v1321_v22 }
  0x6e   : > { %v995_v18 = vadd.f32 %v2871_v40, %v898_v54  ;;  %v1158_v57 = vmul.f32 %v2589_v31, %v3043_v23  ;;  %v1295_v47 = vadd.f32 %v2859_v34, %v1198_v1  ;;  %v1298_v51 = vadd.f32 %v1266_v56, %v1201_v41  ;;  %439 = vst.msk [vmem:[#allocation2 + $0x1f0] sm:$0xff] %vm366_vm1, %v360_v3  ;;  %v3085_v56 = vld [vmem:[#allocation2 + $0x1c8] sm:$0xff] }
  0x6f   : > { %v1306_v12 = vadd.f32 %v1274_v60, %v1209_v33  ;;  %v1210_v44 = vadd.f32 %v1178_v50, %v1113_v38  ;;  %v1255_v42 = vmul.f32 %v2599_v35, %v3051_v45  ;;  %2261 = vmatmul.msk.f32.vlgmr.msra.gmra.mxu1 %vm366_vm1, %v1329_v14  ;;  %v499_v40 = vmul.f32 %v2938_v0, %v2540_v7  ;;  %v3083_v0 = vld [vmem:[#allocation2 + $0x1c7] sm:$0xff]  ;;  %v3108_v14 = vld [vmem:[#allocation2 + $0x130] sm:$0xff] }
  0x70   : > { %v1093_v53 = vadd.f32 %v1061_v24, %v995_v18  ;;  %v1333_v34 = vadd.f32 %v2622_v43, %v1298_v51  ;;  %v693_v50 = vmul.f32 %v2948_v46, %v2545_v9  ;;  %v576_v58 = vmul.f32 %v2593_v32, %v2542_v8  ;;  %v3098_v3 = vld [vmem:[#allocation2 + $0x1c9] sm:$0xff]  ;;  %v3880_v18 = vld [vmem:[#allocation7_spill] sm:$0xff] }
  0x71   : > { %v1341_v60 = vadd.f32 %v2622_v43, %v1306_v12  ;;  %v1307_v39 = vadd.f32 %v1275_v2, %v1210_v44  ;;  %v628_v1 = vadd.f32 %v596_v52, %v499_v40  ;;  %v790_v27 = vmul.f32 %v2957_v6, %v2551_v15  ;;  %v3102_v2 = vld [vmem:[#allocation2 + $0x12f] sm:$0xff] }
  0x72   : > { %v1190_v10 = vadd.f32 %v1158_v57, %v1093_v53  ;;  %v878_v13 = vmul.f32 %v2777_v49, %v2553_v16  ;;  %v1330_v55 = vadd.f32 %v2622_v43, %v1295_v47  ;;  %2265 = vmatmul.msk.f32.gmra.mxu2 %vm366_vm1, %v1333_v34  ;;  %v887_v32 = vmul.f32 %v2959_v5, %v2553_v16 }
  0x73   : > { %2273 = vmatmul.msk.f32.vlgmr.msra.gmra.mxu3 %vm366_vm1, %v1341_v60  ;;  %v984_v46 = vmul.f32 %v2986_v61, %v2560_v19  ;;  %v975_v21 = vmul.f32 %v2826_v36, %v2560_v19  ;;  %v1342_v33 = vadd.f32 %v2622_v43, %v1307_v39  ;;  %v725_v54 = vadd.f32 %v693_v50, %v628_v1  ;;  %v3121_v60 = vld [vmem:[#allocation2 + $0x131] sm:$0xff]  ;;  %v3129_v39 = vld [vmem:[#allocation2 + $0x87] sm:$0xff] }
  0x74   : > { %v1287_v22 = vadd.f32 %v1255_v42, %v1190_v10  ;;  %v716_v38 = vadd.f32 %v2893_v63, %v2953_v62  ;;  %v1082_v41 = vmul.f32 %v2576_v26, %v3083_v0  ;;  %v1179_v24 = vmul.f32 %v2589_v31, %v3085_v56  ;;  %3881 = vst [vmem:[#allocation7_spill] sm:$0xff] %v3121_v60  ;;  %v3882_v50 = vld [vmem:[#allocation25_spill] sm:$0xff]  ;;  %v3133_v10 = vld [vmem:[#allocation2 + $0x88] sm:$0xff] }
  0x75   : > { %v608_v12 = vadd.f32 %v576_v58, %v2901_v48  ;;  %v673_v57 = vmul.f32 %v3880_v18, %v2545_v9  ;;  %v822_v44 = vadd.f32 %v790_v27, %v725_v54  ;;  %v770_v63 = vmul.f32 %v2976_v4, %v2551_v15  ;;  %v3135_v1 = vld [vmem:[#allocation2 + $0x89] sm:$0xff] }
  0x76   : > { %v1322_v47 = vadd.f32 %v2622_v43, %v1287_v22  ;;  %v813_v62 = vadd.f32 %v2897_v29, %v716_v38  ;;  %v1276_v51 = vmul.f32 %v2599_v35, %v3098_v3  ;;  %v1073_v42 = vmul.f32 %v2576_v26, %v3102_v2 }
  0x77   : > { %v705_v48 = vadd.f32 %v673_v57, %v608_v12  ;;  %v867_v53 = vmul.f32 %v2978_v28, %v2553_v16  ;;  %2262 = vmatmul.msk.f32.gmra.mxu1 %vm366_vm1, %v1330_v55  ;;  %v919_v29 = vadd.f32 %v887_v32, %v822_v44  ;;  %v1170_v52 = vmul.f32 %v2589_v31, %v3108_v14  ;;  %v3883_v55 = vld [vmem:[#allocation24_spill] sm:$0xff] }
  0x78   : > { %2254 = vmatmul.msk.f32.gmra.mxu0 %vm366_vm1, %v1322_v47  ;;  %v910_v40 = vadd.f32 %v878_v13, %v813_v62  ;;  %v964_v58 = vmul.f32 %v3882_v50, %v2560_v19  ;;  %v500_v27 = vmul.f32 %v2970_v17, %v2540_v7  ;;  %v597_v32 = vmul.f32 %v3883_v55, %v2542_v8 }
  0x79   : > { %v802_v34 = vadd.f32 %v770_v63, %v705_v48  ;;  %v1016_v13 = vadd.f32 %v984_v46, %v919_v29  ;;  %v1267_v54 = vmul.f32 %v2599_v35, %v3121_v60  ;;  %v694_v38 = vmul.f32 %v2994_v11, %v2545_v9  ;;  %v3884_v63 = vld [vmem:[#allocation26_spill] sm:$0xff] }
  0x7a   : > { %v1007_v22 = vadd.f32 %v975_v21, %v910_v40  ;;  %v1062_v18 = vmul.f32 %v2576_v26, %v3129_v39  ;;  %v629_v57 = vadd.f32 %v597_v32, %v500_v27  ;;  %v791_v17 = vmul.f32 %v3001_v59, %v2551_v15  ;;  %v3886_v27 = vld [vmem:[#allocation11_spill] sm:$0xff]  ;;  %v3887_v32 = vld [vmem:[#allocation12_spill] sm:$0xff] }
  0x7b   : > { %2274 = vmatmul.msk.f32.gmra.mxu3 %vm366_vm1, %v1342_v33  ;;  %v899_v12 = vadd.f32 %v867_v53, %v802_v34  ;;  %v1114_v47 = vadd.f32 %v1082_v41, %v1016_v13  ;;  %v1159_v46 = vmul.f32 %v2589_v31, %v3133_v10  ;;  %v1256_v21 = vmul.f32 %v2599_v35, %v3135_v1  ;;  %v3154_v33 = vld [vmem:[#allocation2 + $0x1cf] sm:$0xff]  ;;  %v3885_v53 = vld [vmem:[#allocation10_spill] sm:$0xff] }
  0x7c   : > { %v1105_v44 = vadd.f32 %v1073_v42, %v1007_v22  ;;  %v726_v62 = vadd.f32 %v694_v38, %v629_v57  ;;  %v888_v48 = vmul.f32 %v3884_v63, %v2553_v16  ;;  %v491_v29 = vmul.f32 %v3885_v53, %v2540_v7  ;;  %v3160_v42 = vld [vmem:[#allocation2 + $0x1d0] sm:$0xff] }
  0x7d   : > { %v996_v11 = vadd.f32 %v964_v58, %v899_v12  ;;  %v1211_v40 = vadd.f32 %v1179_v24, %v1114_v47  ;;  %v3162_v34 = vld [vmem:[#allocation2 + $0x1d1] sm:$0xff]  ;;  %v588_v55 = vmul.f32 %v3886_v27, %v2542_v8  ;;  %v685_v13 = vmul.f32 %v3887_v32, %v2545_v9 }
  0x7e   : > { %v1202_v41 = vadd.f32 %v1170_v52, %v1105_v44  ;;  %v823_v22 = vadd.f32 %v791_v17, %v726_v62  ;;  %v985_v38 = vmul.f32 %v3027_v37, %v2560_v19  ;;  %v1083_v12 = vmul.f32 %v2576_v26, %v3154_v33  ;;  %v361_v24 = vld [vmem:[%s2529_s29 + $0xf0] sm:$0xff]  ;;  %v3888_v44 = vld [vmem:[#allocation27_spill] sm:$0xff] }
  0x7f   : > { %v1094_v58 = vadd.f32 %v1062_v18, %v996_v11  ;;  %v1308_v52 = vadd.f32 %v1276_v51, %v1211_v40  ;;  %v620_v47 = vadd.f32 %v588_v55, %v491_v29  ;;  %v782_v53 = vmul.f32 %v3888_v44, %v2551_v15  ;;  %440 = vst.msk [vmem:[#allocation2 + $0x208] sm:$0xff] %vm366_vm1, %v361_v24  ;;  %v3890_v55 = vld [vmem:[#allocation9_spill] sm:$0xff] }
  0x80   : > { %v1299_v57 = vadd.f32 %v1267_v54, %v1202_v41  ;;  %v920_v32 = vadd.f32 %v888_v48, %v823_v22  ;;  %v1180_v18 = vmul.f32 %v2589_v31, %v3160_v42  ;;  %v1277_v17 = vmul.f32 %v2599_v35, %v3162_v34  ;;  %v3184_v41 = vld [vmem:[#allocation2 + $0x147] sm:$0xff]  ;;  %v362_v22 = vld [vmem:[%s2529_s29 + $0xf8] sm:$0xff] }
  0x81   : > { %v1191_v27 = vadd.f32 %v1159_v46, %v1094_v58  ;;  %v1343_v11 = vadd.f32 %v2622_v43, %v1308_v52  ;;  %v717_v54 = vadd.f32 %v685_v13, %v620_v47  ;;  %v879_v62 = vmul.f32 %v3016_v25, %v2553_v16  ;;  %v3889_v46 = vld [vmem:[#allocation8_spill] sm:$0xff]  ;;  %441 = vst.msk [vmem:[#allocation2 + $0x210] sm:$0xff] %vm366_vm1, %v362_v22 }
  0x82   : > { %v1334_v51 = vadd.f32 %v2622_v43, %v1299_v57  ;;  %v1017_v40 = vadd.f32 %v985_v38, %v920_v32  ;;  %v480_v48 = vmul.f32 %v3889_v46, %v2540_v7  ;;  %v577_v58 = vmul.f32 %v3890_v55, %v2542_v8  ;;  %v3199_v47 = vld [vmem:[#allocation2 + $0x148] sm:$0xff] }
  0x83   : > { %v1288_v29 = vadd.f32 %v1256_v21, %v1191_v27  ;;  %2275 = vmatmul.msk.f32.gmra.mxu3 %vm366_vm1, %v1343_v11  ;;  %v814_v24 = vadd.f32 %v782_v53, %v717_v54  ;;  %v976_v13 = vmul.f32 %v3021_v20, %v2560_v19  ;;  %v3891_v21 = vld [vmem:[#allocation13_spill] sm:$0xff]  ;;  %v771_v32 = vmul.f32 %v3035_v30, %v2551_v15 }
  0x84   : > { %2266 = vmatmul.msk.f32.gmra.mxu2 %vm366_vm1, %v1334_v51  ;;  %v674_v38 = vmul.f32 %v3891_v21, %v2545_v9  ;;  %v1115_v57 = vadd.f32 %v1083_v12, %v1017_v40  ;;  %v609_v27 = vadd.f32 %v577_v58, %v480_v48  ;;  %v1074_v53 = vmul.f32 %v2576_v26, %v3184_v41  ;;  %v3205_v51 = vld [vmem:[#allocation2 + $0x149] sm:$0xff] }
  0x85   : > { %v1323_v52 = vadd.f32 %v2622_v43, %v1288_v29  ;;  %v911_v11 = vadd.f32 %v879_v62, %v814_v24  ;;  %v868_v29 = vmul.f32 %v3043_v23, %v2553_v16  ;;  %v3210_v12 = vld [vmem:[#allocation2 + $0x8f] sm:$0xff]  ;;  %v501_v40 = vmul.f32 %v2957_v6, %v2540_v7 }
  0x86   : > { %v1212_v54 = vadd.f32 %v1180_v18, %v1115_v57  ;;  %v706_v46 = vadd.f32 %v674_v38, %v609_v27  ;;  %v1171_v62 = vmul.f32 %v2589_v31, %v3199_v47  ;;  %v598_v55 = vmul.f32 %v2959_v5, %v2542_v8 }
  0x87   : > { %2255 = vmatmul.msk.f32.gmra.mxu0 %vm366_vm1, %v1323_v52  ;;  %v1008_v48 = vadd.f32 %v976_v13, %v911_v11  ;;  %v695_v58 = vmul.f32 %v2986_v61, %v2545_v9  ;;  %v1268_v22 = vmul.f32 %v2599_v35, %v3205_v51  ;;  %v965_v21 = vmul.f32 %v3051_v45, %v2560_v19  ;;  %v3226_v13 = vld [vmem:[#allocation2 + $0x90] sm:$0xff] }
  0x88   : > { %v1309_v18 = vadd.f32 %v1277_v17, %v1212_v54  ;;  %v803_v24 = vadd.f32 %v771_v32, %v706_v46  ;;  %v1063_v6 = vmul.f32 %v2576_v26, %v3210_v12  ;;  %v3228_v52 = vld [vmem:[#allocation2 + $0x91] sm:$0xff]  ;;  %v630_v5 = vadd.f32 %v598_v55, %v501_v40  ;;  %v3237_v46 = vld [vmem:[#allocation2 + $0x1e7] sm:$0xff] }
  0x89   : > { %v1106_v38 = vadd.f32 %v1074_v53, %v1008_v48  ;;  %v792_v61 = vmul.f32 %v3083_v0, %v2551_v15  ;;  %v889_v27 = vmul.f32 %v3085_v56, %v2553_v16  ;;  %v3892_v32 = vld [vmem:[#allocation14_spill] sm:$0xff]  ;;  %v589_v48 = vmul.f32 %v2777_v49, %v2542_v8 }
  0x8a   : > { %v1344_v17 = vadd.f32 %v2622_v43, %v1309_v18  ;;  %v900_v57 = vadd.f32 %v868_v29, %v803_v24  ;;  %v492_v11 = vmul.f32 %v3892_v32, %v2540_v7  ;;  %v727_v54 = vadd.f32 %v695_v58, %v630_v5 }
  0x8b   : > { %v1203_v53 = vadd.f32 %v1171_v62, %v1106_v38  ;;  %v686_v40 = vmul.f32 %v2826_v36, %v2545_v9  ;;  %v1160_v29 = vmul.f32 %v2589_v31, %v3226_v13  ;;  %v1257_v18 = vmul.f32 %v2599_v35, %v3228_v52  ;;  %v3250_v38 = vld [vmem:[#allocation2 + $0x1e8] sm:$0xff] }
  0x8c   : > { %2276 = vmatmul.msk.f32.gmra.mxu3 %vm366_vm1, %v1344_v17  ;;  %v997_v55 = vadd.f32 %v965_v21, %v900_v57  ;;  %v986_v62 = vmul.f32 %v3098_v3, %v2560_v19  ;;  %v824_v24 = vadd.f32 %v792_v61, %v727_v54  ;;  %v621_v49 = vadd.f32 %v589_v48, %v492_v11  ;;  %v3261_v61 = vld [vmem:[#allocation2 + $0x1e9] sm:$0xff] }
  0x8d   : > { %v1300_v58 = vadd.f32 %v1268_v22, %v1203_v53  ;;  %v783_v36 = vmul.f32 %v3102_v2, %v2551_v15  ;;  %v1084_v21 = vmul.f32 %v2576_v26, %v3237_v46  ;;  %v880_v17 = vmul.f32 %v3108_v14, %v2553_v16  ;;  %v3263_v11 = vld [vmem:[#allocation2 + $0x14f] sm:$0xff] }
  0x8e   : > { %v1095_v5 = vadd.f32 %v1063_v6, %v997_v55  ;;  %v481_v57 = vmul.f32 %v2976_v4, %v2540_v7  ;;  %v921_v22 = vadd.f32 %v889_v27, %v824_v24  ;;  %v718_v53 = vadd.f32 %v686_v40, %v621_v49  ;;  %v3274_v40 = vld [vmem:[#allocation2 + $0x150] sm:$0xff] }
  0x8f   : > { %v1335_v32 = vadd.f32 %v2622_v43, %v1300_v58  ;;  %v578_v6 = vmul.f32 %v2978_v28, %v2542_v8  ;;  %v1181_v48 = vmul.f32 %v2589_v31, %v3250_v38  ;;  %v977_v55 = vmul.f32 %v3121_v60, %v2560_v19 }
  0x90   : > { %v1192_v54 = vadd.f32 %v1160_v29, %v1095_v5  ;;  %v675_v4 = vmul.f32 %v3882_v50, %v2545_v9  ;;  %v1018_v27 = vadd.f32 %v986_v62, %v921_v22  ;;  %v815_v58 = vadd.f32 %v783_v36, %v718_v53  ;;  %v3284_v62 = vld [vmem:[#allocation2 + $0x151] sm:$0xff] }
  0x91   : > { %2267 = vmatmul.msk.f32.gmra.mxu2 %vm366_vm1, %v1335_v32  ;;  %v610_v24 = vadd.f32 %v578_v6, %v481_v57  ;;  %v772_v28 = vmul.f32 %v3129_v39, %v2551_v15  ;;  %v1278_v49 = vmul.f32 %v2599_v35, %v3261_v61  ;;  %v1075_v5 = vmul.f32 %v2576_v26, %v3263_v11 }
  0x92   : > { %v1289_v29 = vadd.f32 %v1257_v18, %v1192_v54  ;;  %v869_v50 = vmul.f32 %v3133_v10, %v2553_v16  ;;  %v1116_v60 = vadd.f32 %v1084_v21, %v1018_v27  ;;  %v912_v32 = vadd.f32 %v880_v17, %v815_v58  ;;  %v3893_v27 = vld [vmem:[#allocation15_spill] sm:$0xff] }
  0x93   : > { %v707_v36 = vadd.f32 %v675_v4, %v610_v24  ;;  %v502_v57 = vmul.f32 %v3001_v59, %v2540_v7  ;;  %v1172_v18 = vmul.f32 %v2589_v31, %v3274_v40  ;;  %v599_v53 = vmul.f32 %v3884_v63, %v2542_v8 }
  0x94   : > { %v1324_v22 = vadd.f32 %v2622_v43, %v1289_v29  ;;  %v696_v6 = vmul.f32 %v3027_v37, %v2545_v9  ;;  %v1213_v54 = vadd.f32 %v1181_v48, %v1116_v60  ;;  %v1009_v21 = vadd.f32 %v977_v55, %v912_v32 }
  0x95   : > { %v804_v17 = vadd.f32 %v772_v28, %v707_v36  ;;  %v966_v4 = vmul.f32 %v3135_v1, %v2560_v19  ;;  %v1269_v59 = vmul.f32 %v2599_v35, %v3284_v62  ;;  %v1064_v58 = vmul.f32 %v2576_v26, %v3893_v27  ;;  %v3306_v28 = vld [vmem:[#allocation2 + $0x1ef] sm:$0xff] }
  0x96   : > { %2256 = vmatmul.msk.f32.gmra.mxu0 %vm366_vm1, %v1324_v22  ;;  %v631_v24 = vadd.f32 %v599_v53, %v502_v57  ;;  %v793_v63 = vmul.f32 %v3154_v33, %v2551_v15  ;;  %v1310_v29 = vadd.f32 %v1278_v49, %v1213_v54  ;;  %v1107_v37 = vadd.f32 %v1075_v5, %v1009_v21 }
  0x97   : > { %v901_v60 = vadd.f32 %v869_v50, %v804_v17  ;;  %v890_v48 = vmul.f32 %v3160_v42, %v2553_v16  ;;  %v493_v32 = vmul.f32 %v3888_v44, %v2540_v7  ;;  %v590_v36 = vmul.f32 %v3016_v25, %v2542_v8  ;;  %v3894_v50 = vld [vmem:[#allocation16_spill] sm:$0xff] }
  0x98   : > { %v728_v55 = vadd.f32 %v696_v6, %v631_v24  ;;  %v687_v57 = vmul.f32 %v3021_v20, %v2545_v9  ;;  %v1345_v22 = vadd.f32 %v2622_v43, %v1310_v29  ;;  %v1204_v49 = vadd.f32 %v1172_v18, %v1107_v37  ;;  %v3895_v20 = vld [vmem:[#allocation17_spill] sm:$0xff] }
  0x99   : > { %v998_v5 = vadd.f32 %v966_v4, %v901_v60  ;;  %v1161_v53 = vmul.f32 %v2589_v31, %v3894_v50  ;;  %v987_v6 = vmul.f32 %v3162_v34, %v2560_v19  ;;  %v622_v21 = vadd.f32 %v590_v36, %v493_v32  ;;  %v3326_v4 = vld [vmem:[#allocation2 + $0x1f0] sm:$0xff]  ;;  %v3348_v50 = vld [vmem:[#allocation2 + $0x168] sm:$0xff] }
  0x9a   : > { %v825_v54 = vadd.f32 %v793_v63, %v728_v55  ;;  %v784_v44 = vmul.f32 %v3184_v41, %v2551_v15  ;;  %2277 = vmatmul.msk.f32.gmra.mxu3 %vm366_vm1, %v1345_v22  ;;  %v1301_v25 = vadd.f32 %v1269_v59, %v1204_v49  ;;  %v1258_v27 = vmul.f32 %v2599_v35, %v3895_v20  ;;  %v3328_v63 = vld [vmem:[#allocation2 + $0x1f1] sm:$0xff]  ;;  %v3335_v55 = vld [vmem:[#allocation2 + $0x167] sm:$0xff] }
  0x9b   : > { %v1096_v17 = vadd.f32 %v1064_v58, %v998_v5  ;;  %v1085_v18 = vmul.f32 %v2576_v26, %v3306_v28  ;;  %v719_v29 = vadd.f32 %v687_v57, %v622_v21  ;;  %v881_v37 = vmul.f32 %v3199_v47, %v2553_v16 }
  0x9c   : > { %v922_v24 = vadd.f32 %v890_v48, %v825_v54  ;;  %v482_v60 = vmul.f32 %v3035_v30, %v2540_v7  ;;  %v1336_v59 = vadd.f32 %v2622_v43, %v1301_v25  ;;  %v579_v32 = vmul.f32 %v3043_v23, %v2542_v8  ;;  %v3357_v25 = vld [vmem:[#allocation2 + $0x169] sm:$0xff] }
  0x9d   : > { %v1193_v58 = vadd.f32 %v1161_v53, %v1096_v17  ;;  %v676_v48 = vmul.f32 %v3051_v45, %v2545_v9  ;;  %v1182_v57 = vmul.f32 %v2589_v31, %v3326_v4  ;;  %v816_v22 = vadd.f32 %v784_v44, %v719_v29 }
  0x9e   : > { %v1019_v36 = vadd.f32 %v987_v6, %v922_v24  ;;  %v978_v49 = vmul.f32 %v3205_v51, %v2560_v19  ;;  %2268 = vmatmul.msk.f32.gmra.mxu2 %vm366_vm1, %v1336_v59  ;;  %v1279_v5 = vmul.f32 %v2599_v35, %v3328_v63  ;;  %v611_v23 = vadd.f32 %v579_v32, %v482_v60 }
  0x9f   : > { %v1290_v30 = vadd.f32 %v1258_v27, %v1193_v58  ;;  %v773_v45 = vmul.f32 %v3210_v12, %v2551_v15  ;;  %v913_v54 = vadd.f32 %v881_v37, %v816_v22  ;;  %v1076_v6 = vmul.f32 %v2576_v26, %v3335_v55 }
  0xa0   : > { %v1117_v53 = vadd.f32 %v1085_v18, %v1019_v36  ;;  %v870_v21 = vmul.f32 %v3226_v13, %v2553_v16  ;;  %v708_v17 = vadd.f32 %v676_v48, %v611_v23  ;;  %v503_v20 = vmul.f32 %v3083_v0, %v2540_v7  ;;  %v3896_v36 = vld [vmem:[#allocation18_spill] sm:$0xff] }
  0xa1   : > { %v1325_v44 = vadd.f32 %v2622_v43, %v1290_v30  ;;  %v600_v27 = vmul.f32 %v3085_v56, %v2542_v8  ;;  %v1010_v18 = vadd.f32 %v978_v49, %v913_v54  ;;  %v1173_v29 = vmul.f32 %v2589_v31, %v3348_v50  ;;  %v3897_v54 = vld [vmem:[#allocation7_spill] sm:$0xff] }
  0xa2   : > { %v1214_v24 = vadd.f32 %v1182_v57, %v1117_v53  ;;  %v697_v37 = vmul.f32 %v3098_v3, %v2545_v9  ;;  %v805_v60 = vadd.f32 %v773_v45, %v708_v17  ;;  %v967_v59 = vmul.f32 %v3228_v52, %v2560_v19  ;;  %v3381_v53 = vld [vmem:[#allocation2 + $0x207] sm:$0xff] }
  0xa3   : > { %2257 = vmatmul.msk.f32.gmra.mxu0 %vm366_vm1, %v1325_v44  ;;  %v632_v58 = vadd.f32 %v600_v27, %v503_v20  ;;  %v794_v0 = vmul.f32 %v3237_v46, %v2551_v15  ;;  %v1108_v56 = vadd.f32 %v1076_v6, %v1010_v18  ;;  %v1270_v48 = vmul.f32 %v2599_v35, %v3357_v25 }
  0xa4   : > { %v1311_v32 = vadd.f32 %v1279_v5, %v1214_v24  ;;  %v1065_v57 = vmul.f32 %v2576_v26, %v3896_v36  ;;  %v902_v22 = vadd.f32 %v870_v21, %v805_v60  ;;  %v891_v49 = vmul.f32 %v3250_v38, %v2553_v16  ;;  %v3898_v21 = vld [vmem:[#allocation19_spill] sm:$0xff]  ;;  %v3899_v24 = vld [vmem:[#allocation20_spill] sm:$0xff] }
  0xa5   : > { %v729_v3 = vadd.f32 %v697_v37, %v632_v58  ;;  %v494_v30 = vmul.f32 %v3102_v2, %v2540_v7  ;;  %v1205_v45 = vadd.f32 %v1173_v29, %v1108_v56  ;;  %v591_v5 = vmul.f32 %v3108_v14, %v2542_v8  ;;  %v3394_v29 = vld [vmem:[#allocation2 + $0x208] sm:$0xff] }
  0xa6   : > { %v1346_v23 = vadd.f32 %v2622_v43, %v1311_v32  ;;  %v688_v6 = vmul.f32 %v3897_v54, %v2545_v9  ;;  %v999_v44 = vadd.f32 %v967_v59, %v902_v22  ;;  %v1162_v17 = vmul.f32 %v2589_v31, %v3898_v21  ;;  %v741_v32 = vld [vmem:[#allocation2 + $0xa7] sm:$0xff] }
  0xa7   : > { %v826_v20 = vadd.f32 %v794_v0, %v729_v3  ;;  %v988_v27 = vmul.f32 %v3261_v61, %v2560_v19  ;;  %v1302_v2 = vadd.f32 %v1270_v48, %v1205_v45  ;;  %v1259_v18 = vmul.f32 %v2599_v35, %v3899_v24  ;;  %v3403_v48 = vld [vmem:[#allocation2 + $0x209] sm:$0xff] }
  0xa8   : > { %2278 = vmatmul.msk.f32.gmra.mxu3 %vm366_vm1, %v1346_v23  ;;  %v623_v14 = vadd.f32 %v591_v5, %v494_v30  ;;  %v785_v37 = vmul.f32 %v3263_v11, %v2551_v15  ;;  %v1097_v60 = vadd.f32 %v1065_v57, %v999_v44  ;;  %v1086_v58 = vmul.f32 %v2576_v26, %v3381_v53  ;;  %v838_v45 = vld [vmem:[#allocation2 + $0xa8] sm:$0xff] }
  0xa9   : > { %v923_v59 = vadd.f32 %v891_v49, %v826_v20  ;;  %v882_v0 = vmul.f32 %v3274_v40, %v2553_v16  ;;  %v1337_v56 = vadd.f32 %v2622_v43, %v1302_v2  ;;  %v483_v22 = vmul.f32 %v3129_v39, %v2540_v7 }
  0xaa   : > { %v720_v36 = vadd.f32 %v688_v6, %v623_v14  ;;  %v580_v3 = vmul.f32 %v3133_v10, %v2542_v8  ;;  %v1194_v57 = vadd.f32 %v1162_v17, %v1097_v60  ;;  %v1183_v30 = vmul.f32 %v2589_v31, %v3394_v29  ;;  %v3900_v17 = vld [vmem:[#allocation21_spill] sm:$0xff] }
  0xab   : > { %v1020_v49 = vadd.f32 %v988_v27, %v923_v59  ;;  %v677_v23 = vmul.f32 %v3135_v1, %v2545_v9  ;;  %2269 = vmatmul.msk.f32.gmra.mxu2 %vm366_vm1, %v1337_v56  ;;  %v979_v54 = vmul.f32 %v3284_v62, %v2560_v19  ;;  %v774_v39 = vmul.f32 %v2551_v15, %v741_v32  ;;  %v935_v27 = vld [vmem:[#allocation2 + $0xa9] sm:$0xff]  ;;  %v3901_v56 = vld [vmem:[#allocation22_spill] sm:$0xff] }
  0xac   : > { %v817_v5 = vadd.f32 %v785_v37, %v720_v36  ;;  %v612_v6 = vadd.f32 %v580_v3, %v483_v22  ;;  %v1291_v44 = vadd.f32 %v1259_v18, %v1194_v57  ;;  %v1280_v21 = vmul.f32 %v2599_v35, %v3403_v48  ;;  %v1033_v59 = vld [vmem:[#allocation2 + $0xc7] sm:$0xff] }
  0xad   : > { %v1118_v10 = vadd.f32 %v1086_v58, %v1020_v49  ;;  %v1077_v20 = vmul.f32 %v2576_v26, %v3900_v17  ;;  %v871_v24 = vmul.f32 %v2553_v16, %v838_v45  ;;  %v504_v14 = vmul.f32 %v3154_v33, %v2540_v7  ;;  %v3902_v3 = vld [vmem:[#allocation23_spill] sm:$0xff]  ;;  %v1130_v49 = vld [vmem:[#allocation2 + $0xc8] sm:$0xff] }
  0xae   : > { %v914_v1 = vadd.f32 %v882_v0, %v817_v5  ;;  %v709_v2 = vadd.f32 %v677_v23, %v612_v6  ;;  %v1326_v37 = vadd.f32 %v2622_v43, %v1291_v44  ;;  %v601_v18 = vmul.f32 %v3160_v42, %v2542_v8  ;;  %v1227_v6 = vld [vmem:[#allocation2 + $0xc9] sm:$0xff] }
  0xaf   : > { %v1215_v60 = vadd.f32 %v1183_v30, %v1118_v10  ;;  %v698_v58 = vmul.f32 %v3162_v34, %v2545_v9  ;;  %v1174_v0 = vmul.f32 %v2589_v31, %v3901_v56  ;;  %v968_v22 = vmul.f32 %v2560_v19, %v935_v27  ;;  %v3441_v44 = vld [vmem:[#allocation2 + $0x20f] sm:$0xff] }
  0xb0   : > { %v1011_v32 = vadd.f32 %v979_v54, %v914_v1  ;;  %v806_v36 = vadd.f32 %v774_v39, %v709_v2  ;;  %2258 = vmatmul.msk.f32.gmra.mxu0 %vm366_vm1, %v1326_v37  ;;  %v1271_v57 = vmul.f32 %v2599_v35, %v3902_v3  ;;  %v633_v30 = vadd.f32 %v601_v18, %v504_v14  ;;  %v3458_v18 = vld [vmem:[#allocation2 + $0x210] sm:$0xff] }
  0xb1   : > { %v1312_v33 = vadd.f32 %v1280_v21, %v1215_v60  ;;  %v795_v42 = vmul.f32 %v3306_v28, %v2551_v15  ;;  %v1066_v45 = vmul.f32 %v2576_v26, %v1033_v59  ;;  %v892_v5 = vmul.f32 %v3326_v4, %v2553_v16 }
  0xb2   : > { %v1109_v23 = vadd.f32 %v1077_v20, %v1011_v32  ;;  %v903_v34 = vadd.f32 %v871_v24, %v806_v36  ;;  %v730_v39 = vadd.f32 %v698_v58, %v633_v30  ;;  %v495_v10 = vmul.f32 %v3184_v41, %v2540_v7  ;;  %v3460_v58 = vld [vmem:[#allocation2 + $0x211] sm:$0xff] }
  0xb3   : > { %v1347_v54 = vadd.f32 %v2622_v43, %v1312_v33  ;;  %v592_v21 = vmul.f32 %v3199_v47, %v2542_v8  ;;  %v1163_v27 = vmul.f32 %v2589_v31, %v1130_v49  ;;  %v689_v1 = vmul.f32 %v3205_v51, %v2545_v9  ;;  %v1045_v33 = vld [vmem:[#allocation2 + $0x187] sm:$0xff]  ;;  %v839_v49 = vld [vmem:[#allocation2 + $0xb0] sm:$0xff] }
  0xb4   : > { %v1206_v17 = vadd.f32 %v1174_v0, %v1109_v23  ;;  %v1000_v20 = vadd.f32 %v968_v22, %v903_v34  ;;  %v827_v2 = vadd.f32 %v795_v42, %v730_v39  ;;  %v989_v24 = vmul.f32 %v3328_v63, %v2560_v19 }
  0xb5   : > { %2279 = vmatmul.msk.f32.gmra.mxu3 %vm366_vm1, %v1347_v54  ;;  %v624_v14 = vadd.f32 %v592_v21, %v495_v10  ;;  %v786_v41 = vmul.f32 %v3335_v55, %v2551_v15  ;;  %v1260_v47 = vmul.f32 %v2599_v35, %v1227_v6  ;;  %v1087_v59 = vmul.f32 %v2576_v26, %v3441_v44  ;;  %v742_v55 = vld [vmem:[#allocation2 + $0xaf] sm:$0xff] }
  0xb6   : > { %v1303_v37 = vadd.f32 %v1271_v57, %v1206_v17  ;;  %v1098_v60 = vadd.f32 %v1066_v45, %v1000_v20  ;;  %v924_v51 = vadd.f32 %v892_v5, %v827_v2  ;;  %v883_v56 = vmul.f32 %v3348_v50, %v2553_v16  ;;  %v1142_v45 = vld [vmem:[#allocation2 + $0x188] sm:$0xff]  ;;  %v936_v10 = vld [vmem:[#allocation2 + $0xb1] sm:$0xff] }
  0xb7   : > { %v721_v32 = vadd.f32 %v689_v1, %v624_v14  ;;  %v484_v0 = vmul.f32 %v3210_v12, %v2540_v7  ;;  %v581_v3 = vmul.f32 %v3226_v13, %v2542_v8  ;;  %v678_v57 = vmul.f32 %v3228_v52, %v2545_v9  ;;  %v1034_v20 = vld [vmem:[#allocation2 + $0xcf] sm:$0xff] }
  0xb8   : > { %v1338_v36 = vadd.f32 %v2622_v43, %v1303_v37  ;;  %v1195_v22 = vadd.f32 %v1163_v27, %v1098_v60  ;;  %v1021_v30 = vadd.f32 %v989_v24, %v924_v51  ;;  %v1184_v42 = vmul.f32 %v2589_v31, %v3458_v18 }
  0xb9   : > { %v818_v50 = vadd.f32 %v786_v41, %v721_v32  ;;  %v980_v12 = vmul.f32 %v3357_v25, %v2560_v19  ;;  %v1281_v34 = vmul.f32 %v2599_v35, %v3460_v58  ;;  %v613_v13 = vadd.f32 %v581_v3, %v484_v0  ;;  %v1239_v25 = vld [vmem:[#allocation2 + $0x189] sm:$0xff] }
  0xba   : > { %2270 = vmatmul.msk.f32.gmra.mxu2 %vm366_vm1, %v1338_v36  ;;  %v1292_v23 = vadd.f32 %v1260_v47, %v1195_v22  ;;  %v775_v5 = vmul.f32 %v2551_v15, %v742_v55  ;;  %v1119_v52 = vadd.f32 %v1087_v59, %v1021_v30  ;;  %v1078_v6 = vmul.f32 %v2576_v26, %v1045_v33  ;;  %v1228_v55 = vld [vmem:[#allocation2 + $0xd1] sm:$0xff] }
  0xbb   : > { %v915_v54 = vadd.f32 %v883_v56, %v818_v50  ;;  %v872_v39 = vmul.f32 %v2553_v16, %v839_v49  ;;  %v710_v17 = vadd.f32 %v678_v57, %v613_v13  ;;  %v505_v27 = vmul.f32 %v3237_v46, %v2540_v7  ;;  %v1131_v56 = vld [vmem:[#allocation2 + $0xd0] sm:$0xff]  ;;  %v1055_v57 = vld [vmem:[#allocation2 + $0x227] sm:$0xff] }
  0xbc   : > { %v1327_v21 = vadd.f32 %v2622_v43, %v1292_v23  ;;  %v602_v1 = vmul.f32 %v3250_v38, %v2542_v8  ;;  %v1216_v2 = vadd.f32 %v1184_v42, %v1119_v52  ;;  %v1175_v14 = vmul.f32 %v2589_v31, %v1142_v45  ;;  %v754_v33 = vld [vmem:[#allocation2 + $0x16f] sm:$0xff] }
  0xbd   : > { %v1012_v24 = vadd.f32 %v980_v12, %v915_v54  ;;  %v699_v41 = vmul.f32 %v3261_v61, %v2545_v9  ;;  %v807_v37 = vadd.f32 %v775_v5, %v710_v17  ;;  %v969_v60 = vmul.f32 %v2560_v19, %v936_v10  ;;  %v851_v42 = vld [vmem:[#allocation2 + $0x170] sm:$0xff]  ;;  %v1152_v45 = vld [vmem:[#allocation2 + $0x228] sm:$0xff] }
  0xbe   : > { %2259 = vmatmul.msk.f32.gmra.mxu0 %vm366_vm1, %v1327_v21  ;;  %v634_v47 = vadd.f32 %v602_v1, %v505_v27  ;;  %v796_v59 = vmul.f32 %v3381_v53, %v2551_v15  ;;  %v1313_v46 = vadd.f32 %v1281_v34, %v1216_v2  ;;  %v1272_v38 = vmul.f32 %v2599_v35, %v1239_v25  ;;  %v1249_v10 = vld [vmem:[#allocation2 + $0x229] sm:$0xff] }
  0xbf   : > { %v1110_v51 = vadd.f32 %v1078_v6, %v1012_v24  ;;  %v1067_v32 = vmul.f32 %v2576_v26, %v1034_v20  ;;  %v904_v0 = vadd.f32 %v872_v39, %v807_v37  ;;  %v893_v61 = vmul.f32 %v3394_v29, %v2553_v16  ;;  %v948_v6 = vld [vmem:[#allocation2 + $0x171] sm:$0xff]  ;;  %v3520_v20 = vld [vmem:[%s3824_s4] ss:$0 sm:$0xff] }
  0xc0   : > { %v731_v36 = vadd.f32 %v699_v41, %v634_v47  ;;  %v496_v22 = vmul.f32 %v3263_v11, %v2540_v7  ;;  %v1348_v3 = vadd.f32 %v2622_v43, %v1313_v46  ;;  %v593_v49 = vmul.f32 %v3274_v40, %v2542_v8  ;;  %v1046_v21 = vld [vmem:[#allocation2 + $0x18f] sm:$0xff] }
  0xc1   : > { %v1207_v53 = vadd.f32 %v1175_v14, %v1110_v51  ;;  %v690_v30 = vmul.f32 %v3284_v62, %v2545_v9  ;;  %v1001_v50 = vadd.f32 %v969_v60, %v904_v0  ;;  %v1164_v12 = vmul.f32 %v2589_v31, %v1131_v56  ;;  %v1473_v14 = vpop.f32.mrf.mxu0  ;;  %v1240_v51 = vld [vmem:[#allocation2 + $0x191] sm:$0xff] }
  0xc2   : > { %v828_v23 = vadd.f32 %v796_v59, %v731_v36  ;;  %v990_v29 = vmul.f32 %v3403_v48, %v2560_v19  ;;  %2280 = vmatmul.msk.f32.gmra.mxu3 %vm366_vm1, %v1348_v3  ;;  %v1261_v34 = vmul.f32 %v2599_v35, %v1228_v55  ;;  %v625_v13 = vadd.f32 %v593_v49, %v496_v22 }
  0xc3   : > { %v1304_v11 = vadd.f32 %v1272_v38, %v1207_v53  ;;  %v787_v40 = vmul.f32 %v2551_v15, %v754_v33  ;;  %v1099_v5 = vadd.f32 %v1067_v32, %v1001_v50  ;;  %v1088_v62 = vmul.f32 %v2576_v26, %v1055_v57  ;;  %v1153_v33 = vld [vmem:[#allocation2 + $0x230] sm:$0xff] }
  0xc4   : > { %v925_v52 = vadd.f32 %v893_v61, %v828_v23  ;;  %v884_v54 = vmul.f32 %v2553_v16, %v851_v42  ;;  %v722_v48 = vadd.f32 %v690_v30, %v625_v13  ;;  %v506_v25 = vmul.f32 %v3306_v28, %v2540_v7  ;;  %v1143_v28 = vld [vmem:[#allocation2 + $0x190] sm:$0xff] }
  0xc5   : > { %v1339_v39 = vadd.f32 %v2622_v43, %v1304_v11  ;;  %v603_v17 = vmul.f32 %v3326_v4, %v2542_v8  ;;  %v1196_v27 = vadd.f32 %v1164_v12, %v1099_v5  ;;  %v1185_v2 = vmul.f32 %v2589_v31, %v1152_v45 }
  0xc6   : > { %v1022_v1 = vadd.f32 %v990_v29, %v925_v52  ;;  %v700_v24 = vmul.f32 %v3328_v63, %v2545_v9  ;;  %v819_v41 = vadd.f32 %v787_v40, %v722_v48  ;;  %v981_v7 = vmul.f32 %v2560_v19, %v948_v6 }
  0xc7   : > { %2271 = vmatmul.msk.f32.gmra.mxu2 %vm366_vm1, %v1339_v39  ;;  %v635_v8 = vadd.f32 %v603_v17, %v506_v25  ;;  %v797_v4 = vmul.f32 %v3441_v44, %v2551_v15  ;;  %v1293_v37 = vadd.f32 %v1261_v34, %v1196_v27  ;;  %v1282_v47 = vmul.f32 %v2599_v35, %v1249_v10  ;;  %v1056_v15 = vld [vmem:[#allocation2 + $0x22f] sm:$0xff] }
  0xc8   : > { %v1120_v60 = vadd.f32 %v1088_v62, %v1022_v1  ;;  %v1079_v59 = vmul.f32 %v2576_v26, %v1046_v21  ;;  %v916_v46 = vadd.f32 %v884_v54, %v819_v41  ;;  %v894_v63 = vmul.f32 %v3458_v18, %v2553_v16 }
  0xc9   : > { %v732_v9 = vadd.f32 %v700_v24, %v635_v8  ;;  %v1474_v38 = vadd.f32 %v3520_v20, %v1473_v14  ;;  %v1328_v32 = vadd.f32 %v2622_v43, %v1293_v37  ;;  %v1176_v0 = vmul.f32 %v2589_v31, %v1143_v28 }
  0xca   : > { %v1217_v56 = vadd.f32 %v1185_v2, %v1120_v60  ;;  %v1013_v44 = vadd.f32 %v981_v7, %v916_v46  ;;  %v991_v36 = vmul.f32 %v3460_v58, %v2560_v19  ;;  %v3903_v22 = vmov 0.0   ;;  %v1250_v58 = vld [vmem:[#allocation2 + $0x231] sm:$0xff] }
  0xcb   : > { %v829_v55 = vadd.f32 %v797_v4, %v732_v9  ;;  %v1569_v61 = vmax.f32 %v1474_v38, 0.0  ;;  %1637 = vst.msk [vmem:[#allocation3] sm:$0xff] %vm1636_vm3, %v3903_v22  ;;  %2260 = vmatmul.msk.f32.gmra.mxu0 %vm366_vm1, %v1328_v32  ;;  %v1273_v18 = vmul.f32 %v2599_v35, %v1240_v51  ;;  %v1089_v57 = vmul.f32 %v2576_v26, %v1056_v15 }
  0xcc   : > { %v1314_v16 = vadd.f32 %v1282_v47, %v1217_v56  ;;  %1638 = vst.msk [vmem:[#allocation3 + $0x8] sm:$0xff] %vm1636_vm3, %v3903_v22  ;;  %v1111_v3 = vadd.f32 %v1079_v59, %v1013_v44  ;;  %v1186_v50 = vmul.f32 %v2589_v31, %v1153_v33  ;;  %v1283_v29 = vmul.f32 %v2599_v35, %v1250_v58  ;;  %v1633_v47 = vld [vmem:[%s3825_s5] sm:$0xff] }
  0xcd   : > { %v926_v53 = vadd.f32 %v894_v63, %v829_v55  ;;  %v1601_v49 = vmin.f32 %v1569_v61, 6.0  ;;  %1639 = vst.msk [vmem:[#allocation3 + $0x10] sm:$0xff] %vm1636_vm3, %v3903_v22  ;;  %v3605_v51 = vperm.slane %v1633_v47, 0  ;;  %v3607_v9 = vperm.slane %v1633_v47, 1 }
  0xce   : > { %v1349_v19 = vadd.f32 %v2622_v43, %v1314_v16  ;;  %v1208_v30 = vadd.f32 %v1176_v0, %v1111_v3  ;;  %1648 = vst.msk [vmem:[#allocation3 + $0x20] sm:$0xff] %vm1636_vm3, %v3903_v22  ;;  %v3611_v16 = vperm.slane %v1633_v47, 2  ;;  %v3614_v33 = vperm.slane %v1633_v47, 3 }
  0xcf   : > { %v1023_v42 = vadd.f32 %v991_v36, %v926_v53  ;;  %1680 = vst.msk [vmem:[#allocation3 + $0x28] sm:$0xff] %vm1636_vm3, %v1601_v49 }
  0xd0   : > { %2281 = vmatmul.msk.f32.gmra.mxu3 %vm366_vm1, %v1349_v19  ;;  %v1305_v12 = vadd.f32 %v1273_v18, %v1208_v30  ;;  %1649 = vst.msk [vmem:[#allocation3 + $0x40] sm:$0xff] %vm1636_vm3, %v3903_v22 }
  0xd1   : > { %v1121_v23 = vadd.f32 %v1089_v57, %v1023_v42  ;;  %1650 = vst.msk [vmem:[#allocation3 + $0x60] sm:$0xff] %vm1636_vm3, %v3903_v22  ;;  %v1476_v34 = vpop.f32.mrf.mxu0 }
  0xd2   : > { %v1340_v26 = vadd.f32 %v2622_v43, %v1305_v12  ;;  %1651 = vst.msk [vmem:[#allocation3 + $0x80] sm:$0xff] %vm1636_vm3, %v3903_v22  ;;  %v1477_v45 = vadd.f32 %v3520_v20, %v1476_v34 }
  0xd3   : > { %v1218_v11 = vadd.f32 %v1186_v50, %v1121_v23  ;;  %1652 = vst.msk [vmem:[#allocation3 + $0xa0] sm:$0xff] %vm1636_vm3, %v3903_v22  ;;  %v1509_v13 = vpop.f32.mrf.mxu2  ;;  %v3622_v50 = vperm.slane %v1633_v47, 4 }
  0xd4   : > { %2272 = vmatmul.msk.f32.gmra.mxu2 %vm366_vm1, %v1340_v26  ;;  %1653 = vst.msk [vmem:[#allocation3 + $0xc0] sm:$0xff] %vm1636_vm3, %v3903_v22  ;;  %v1510_v40 = vadd.f32 %v3520_v20, %v1509_v13  ;;  %v1713_v32 = vld [vmem:[#allocation3 + $0x7] ss:$2 sm:$0xff]  ;;  %v1746_v56 = vld [vmem:[#allocation3 + $0x8] ss:$2 sm:$0xff] }
  0xd5   : > { %v1315_v31 = vadd.f32 %v1283_v29, %v1218_v11  ;;  %1654 = vst.msk [vmem:[#allocation3 + $0xe0] sm:$0xff] %vm1636_vm3, %v3903_v22  ;;  %v1729_v44 = vmul.f32 %v3605_v51, %v1713_v32  ;;  %v1762_v55 = vmul.f32 %v3607_v9, %v1746_v56  ;;  %v3626_v11 = vperm.slane %v1633_v47, 5 }
  0xd6   : > { %1655 = vst.msk [vmem:[#allocation3 + $0x100] sm:$0xff] %vm1636_vm3, %v3903_v22  ;;  %v1581_v5 = vmax.f32 %v1510_v40, 0.0 }
  0xd7   : > { %v1350_v35 = vadd.f32 %v2622_v43, %v1315_v31  ;;  %1656 = vst.msk [vmem:[#allocation3 + $0x120] sm:$0xff] %vm1636_vm3, %v3903_v22  ;;  %v1570_v43 = vmax.f32 %v1477_v45, 0.0  ;;  %v1770_v18 = vadd.f32 %v1762_v55, %v1729_v44 }
  0xd8   : > { %1657 = vst.msk [vmem:[#allocation3 + $0x140] sm:$0xff] %vm1636_vm3, %v3903_v22  ;;  %v1613_v62 = vmin.f32 %v1581_v5, 6.0 }
  0xd9   : > { %2282 = vmatmul.msk.f32.gmra.mxu3 %vm366_vm1, %v1350_v35  ;;  %1658 = vst.msk [vmem:[#allocation3 + $0x160] sm:$0xff] %vm1636_vm3, %v3903_v22  ;;  %v1602_v52 = vmin.f32 %v1570_v43, 6.0 }
  0xda   : > { %1659 = vst.msk [vmem:[#allocation3 + $0x180] sm:$0xff] %vm1636_vm3, %v3903_v22 }
  0xdb   : > { %1660 = vst.msk [vmem:[#allocation3 + $0x1a0] sm:$0xff] %vm1636_vm3, %v3903_v22 }
  0xdc   : > { %1661 = vst.msk [vmem:[#allocation3 + $0x1c0] sm:$0xff] %vm1636_vm3, %v3903_v22 }
  0xdd   : > { %1662 = vst.msk [vmem:[#allocation3 + $0x1e0] sm:$0xff] %vm1636_vm3, %v3903_v22 }
  0xde   : > { %1663 = vst.msk [vmem:[#allocation3 + $0x200] sm:$0xff] %vm1636_vm3, %v3903_v22  ;;  %v1779_v22 = vld [vmem:[#allocation3 + $0x9] ss:$2 sm:$0xff] }
  0xdf   : > { %1681 = vst.msk [vmem:[#allocation3 + $0x30] sm:$0xff] %vm1636_vm3, %v1602_v52  ;;  %v1795_v53 = vmul.f32 %v3611_v16, %v1779_v22 }
  0xe0   : > { %1692 = vst.msk [vmem:[#allocation3 + $0xe8] sm:$0xff] %vm1636_vm3, %v1613_v62 }
  0xe1   : > { %v1512_v54 = vpop.f32.mrf.mxu2  ;;  %v1803_v58 = vadd.f32 %v1795_v53, %v1770_v18 }
  0xe2   : > { %v1513_v6 = vadd.f32 %v3520_v20, %v1512_v54 }
  0xe4   : > { %v1582_v39 = vmax.f32 %v1513_v6, 0.0 }
  0xe6   : > { %v1614_v48 = vmin.f32 %v1582_v39, 6.0  ;;  %v1812_v57 = vld [vmem:[#allocation3 + $0x27] ss:$2 sm:$0xff]  ;;  %v1845_v12 = vld [vmem:[#allocation3 + $0x28] ss:$2 sm:$0xff] }
  0xe7   : > { %v1828_v30 = vmul.f32 %v3614_v33, %v1812_v57  ;;  %v1861_v31 = vmul.f32 %v3622_v50, %v1845_v12  ;;  %v1878_v35 = vld [vmem:[#allocation3 + $0x29] ss:$2 sm:$0xff] }
  0xe8   : > { %1693 = vst.msk [vmem:[#allocation3 + $0xf0] sm:$0xff] %vm1636_vm3, %v1614_v48  ;;  %v1894_v62 = vmul.f32 %v3626_v11, %v1878_v35  ;;  %v2038_v39 = vld [vmem:[%s3827_s7 + $0x8] sm:$0xff]  ;;  %v3638_v48 = vperm.slane %v1633_v47, 6 }
  0xe9   : > { %v1836_v29 = vadd.f32 %v1828_v30, %v1803_v58  ;;  %2081 = vmatpush.msrb.mxu1 %v2038_v39 }
  0xea   : > { %v1479_v10 = vpop.f32.mrf.mxu0 }
  0xeb   : > { %v1480_v21 = vadd.f32 %v3520_v20, %v1479_v10  ;;  %v1869_v5 = vadd.f32 %v1861_v31, %v1836_v29  ;;  %v2037_v10 = vld [vmem:[%s3827_s7] sm:$0xff] }
  0xec   : > { %v1503_v25 = vpop.f32.mrf.mxu1  ;;  %2082 = vmatpush.msrb.mxu1 %v2037_v10 }
  0xed   : > { %v1504_v17 = vadd.f32 %v3520_v20, %v1503_v25  ;;  %v1571_v27 = vmax.f32 %v1480_v21, 0.0 }
  0xef   : > { %v1579_v1 = vmax.f32 %v1504_v17, 0.0  ;;  %v1603_v2 = vmin.f32 %v1571_v27, 6.0  ;;  %v3641_v17 = vperm.slane %v1633_v47, 7 }
  0xf1   : > { %v1611_v24 = vmin.f32 %v1579_v1, 6.0  ;;  %1682 = vst.msk [vmem:[#allocation3 + $0x48] sm:$0xff] %vm1636_vm3, %v1603_v2  ;;  %v1902_v2 = vadd.f32 %v1894_v62, %v1869_v5 }
  0xf3   : > { %1690 = vst.msk [vmem:[#allocation3 + $0xc8] sm:$0xff] %vm1636_vm3, %v1611_v24 }
  0xf4   : > { %v1506_v41 = vpop.f32.mrf.mxu1 }
  0xf5   : > { %v1507_v28 = vadd.f32 %v3520_v20, %v1506_v41  ;;  %v1482_v8 = vpop.f32.mrf.mxu0  ;;  %v1515_v4 = vpop.f32.mrf.mxu2  ;;  %v3647_v41 = vld [vmem:[%s3825_s5 + $0x8] ss:$0 sm:$0xff] }
  0xf6   : > { %v1539_v14 = vpop.f32.mrf.mxu3  ;;  %v1483_v37 = vadd.f32 %v3520_v20, %v1482_v8  ;;  %v1516_v60 = vadd.f32 %v3520_v20, %v1515_v4 }
  0xf7   : > { %v1540_v7 = vadd.f32 %v3520_v20, %v1539_v14  ;;  %v1580_v46 = vmax.f32 %v1507_v28, 0.0 }
  0xf8   : > { %v1572_v63 = vmax.f32 %v1483_v37, 0.0  ;;  %v1583_v38 = vmax.f32 %v1516_v60, 0.0  ;;  %v3656_v60 = vld [vmem:[%s3826_s6] ss:$0 sm:$0xff] }
  0xf9   : > { %v1591_v59 = vmax.f32 %v1540_v7, 0.0  ;;  %v1612_v15 = vmin.f32 %v1580_v46, 6.0 }
  0xfa   : > { %v1604_v36 = vmin.f32 %v1572_v63, 6.0  ;;  %v1615_v61 = vmin.f32 %v1583_v38, 6.0 }
  0xfb   : > { %v1623_v0 = vmin.f32 %v1591_v59, 6.0  ;;  %1691 = vst.msk [vmem:[#allocation3 + $0xd0] sm:$0xff] %vm1636_vm3, %v1612_v15 }
  0xfc   : > { %1683 = vst.msk [vmem:[#allocation3 + $0x50] sm:$0xff] %vm1636_vm3, %v1604_v36 }
  0xfd   : > { %1702 = vst.msk [vmem:[#allocation3 + $0x188] sm:$0xff] %vm1636_vm3, %v1623_v0 }
  0xfe   : > { %v1542_v3 = vpop.f32.mrf.mxu3  ;;  %1694 = vst.msk [vmem:[#allocation3 + $0x108] sm:$0xff] %vm1636_vm3, %v1615_v61 }
  0xff   : > { %v1543_v49 = vadd.f32 %v3520_v20, %v1542_v3 }
 0x101   : > { %v1592_v19 = vmax.f32 %v1543_v49, 0.0 }
 0x103   : > { %v1624_v42 = vmin.f32 %v1592_v19, 6.0  ;;  %v1912_v21 = vld [vmem:[#allocation3 + $0x47] ss:$2 sm:$0xff]  ;;  %v1945_v25 = vld [vmem:[#allocation3 + $0x48] ss:$2 sm:$0xff] }
 0x104   : > { %v1485_v23 = vpop.f32.mrf.mxu0  ;;  %v1928_v24 = vmul.f32 %v3638_v48, %v1912_v21  ;;  %v1978_v14 = vld [vmem:[#allocation3 + $0x49] ss:$2 sm:$0xff]  ;;  %v1961_v28 = vmul.f32 %v3641_v17, %v1945_v25  ;;  %v1748_v35 = vld [vmem:[#allocation3 + $0x48] ss:$2 sm:$0xff] }
 0x105   : > { %1703 = vst.msk [vmem:[#allocation3 + $0x190] sm:$0xff] %vm1636_vm3, %v1624_v42  ;;  %v1486_v26 = vadd.f32 %v3520_v20, %v1485_v23  ;;  %v1994_v37 = vmul.f32 %v3647_v41, %v1978_v14  ;;  %v1715_v31 = vld [vmem:[#allocation3 + $0x47] ss:$2 sm:$0xff] }
 0x106   : > { %v1545_v34 = vpop.f32.mrf.mxu3  ;;  %v1936_v7 = vadd.f32 %v1928_v24, %v1902_v2 }
 0x107   : > { %v1573_v45 = vmax.f32 %v1486_v26, 0.0  ;;  %v1518_v13 = vpop.f32.mrf.mxu2  ;;  %v1546_v43 = vadd.f32 %v3520_v20, %v1545_v34 }
 0x108   : > { %v1519_v40 = vadd.f32 %v3520_v20, %v1518_v13  ;;  %v1969_v4 = vadd.f32 %v1961_v28, %v1936_v7  ;;  %v1763_v13 = vmul.f32 %v3607_v9, %v1748_v35  ;;  %v1785_v35 = vld [vmem:[#allocation3 + $0xc9] ss:$2 sm:$0xff] }
 0x109   : > { %v1605_v52 = vmin.f32 %v1573_v45, 6.0  ;;  %v1593_v54 = vmax.f32 %v1546_v43, 0.0  ;;  %v1730_v45 = vmul.f32 %v3605_v51, %v1715_v31 }
 0x10a   : > { %v1584_v6 = vmax.f32 %v1519_v40, 0.0  ;;  %v2002_v59 = vadd.f32 %v1994_v37, %v1969_v4 }
 0x10b   : > { %1684 = vst.msk [vmem:[#allocation3 + $0x68] sm:$0xff] %vm1636_vm3, %v1605_v52  ;;  %v1625_v27 = vmin.f32 %v1593_v54, 6.0  ;;  %v1781_v52 = vld [vmem:[#allocation3 + $0x49] ss:$2 sm:$0xff]  ;;  %v1771_v39 = vadd.f32 %v1763_v13, %v1730_v45 }
 0x10c   : > { %v1616_v1 = vmin.f32 %v1584_v6, 6.0  ;;  %v2013_v38 = vadd.f32 %v3656_v60, %v2002_v59 }
 0x10d   : > { %1704 = vst.msk [vmem:[#allocation3 + $0x1a8] sm:$0xff] %vm1636_vm3, %v1625_v27  ;;  %v1796_v27 = vmul.f32 %v3611_v16, %v1781_v52  ;;  %v1818_v52 = vld [vmem:[#allocation3 + $0xe7] ss:$2 sm:$0xff] }
 0x10e   : > { %1695 = vst.msk [vmem:[#allocation3 + $0x110] sm:$0xff] %vm1636_vm3, %v1616_v1  ;;  %v2021_v44 = vmax.f32 %v2013_v38, 0.0 }
 0x10f   : > { %v1548_v8 = vpop.f32.mrf.mxu3  ;;  %v1804_v14 = vadd.f32 %v1796_v27, %v1771_v39 }
 0x110   : > { %v1549_v47 = vadd.f32 %v3520_v20, %v1548_v8  ;;  %v2029_v61 = vmin.f32 %v2021_v44, 6.0 }
 0x112   : > { %v1594_v46 = vmax.f32 %v1549_v47, 0.0  ;;  %2283 = vmatmul.msk.f32.vlgmr.msrb.gmra.mxu1 %vm1636_vm3, %v2029_v61 }
 0x113   : > { %v1488_v63 = vpop.f32.mrf.mxu0 }
 0x114   : > { %v1626_v32 = vmin.f32 %v1594_v46, 6.0  ;;  %v1489_v56 = vadd.f32 %v3520_v20, %v1488_v63  ;;  %v1521_v0 = vpop.f32.mrf.mxu2 }
 0x115   : > { %v1522_v15 = vadd.f32 %v3520_v20, %v1521_v0 }
 0x116   : > { %1705 = vst.msk [vmem:[#allocation3 + $0x1b0] sm:$0xff] %vm1636_vm3, %v1626_v32  ;;  %v1574_v55 = vmax.f32 %v1489_v56, 0.0 }
 0x117   : > { %v1585_v36 = vmax.f32 %v1522_v15, 0.0 }
 0x118   : > { %v1606_v22 = vmin.f32 %v1574_v55, 6.0 }
 0x119   : > { %v1617_v18 = vmin.f32 %v1585_v36, 6.0 }
 0x11a   : > { %1685 = vst.msk [vmem:[#allocation3 + $0x70] sm:$0xff] %vm1636_vm3, %v1606_v22 }
 0x11b   : > { %1696 = vst.msk [vmem:[#allocation3 + $0x128] sm:$0xff] %vm1636_vm3, %v1617_v18 }
 0x11d   : > { %v1551_v3 = vpop.f32.mrf.mxu3 }
 0x11e   : > { %v1552_v53 = vadd.f32 %v3520_v20, %v1551_v3 }
 0x120   : > { %v1491_v57 = vpop.f32.mrf.mxu0  ;;  %v1595_v49 = vmax.f32 %v1552_v53, 0.0 }
 0x121   : > { %v1492_v19 = vadd.f32 %v3520_v20, %v1491_v57  ;;  %v1524_v58 = vpop.f32.mrf.mxu2  ;;  %v1814_v62 = vld [vmem:[#allocation3 + $0x67] ss:$2 sm:$0xff]  ;;  %v1847_v28 = vld [vmem:[#allocation3 + $0x68] ss:$2 sm:$0xff] }
 0x122   : > { %v1627_v30 = vmin.f32 %v1595_v49, 6.0  ;;  %v1525_v12 = vadd.f32 %v3520_v20, %v1524_v58  ;;  %v1829_v1 = vmul.f32 %v3614_v33, %v1814_v62  ;;  %v1862_v4 = vmul.f32 %v3622_v50, %v1847_v28  ;;  %v1880_v47 = vld [vmem:[#allocation3 + $0x69] ss:$2 sm:$0xff] }
 0x123   : > { %v1575_v42 = vmax.f32 %v1492_v19, 0.0  ;;  %v1895_v32 = vmul.f32 %v3626_v11, %v1880_v47  ;;  %v1719_v58 = vld [vmem:[#allocation3 + $0xc7] ss:$2 sm:$0xff] }
 0x124   : > { %1706 = vst.msk [vmem:[#allocation3 + $0x1c8] sm:$0xff] %vm1636_vm3, %v1627_v30  ;;  %v1586_v29 = vmax.f32 %v1525_v12, 0.0  ;;  %v1837_v8 = vadd.f32 %v1829_v1, %v1804_v14  ;;  %v1752_v30 = vld [vmem:[#allocation3 + $0xc8] ss:$2 sm:$0xff]  ;;  %v1831_v1 = vmul.f32 %v3614_v33, %v1818_v52 }
 0x125   : > { %v1607_v23 = vmin.f32 %v1575_v42, 6.0  ;;  %v1765_v31 = vmul.f32 %v3607_v9, %v1752_v30 }
 0x126   : > { %v1618_v26 = vmin.f32 %v1586_v29, 6.0  ;;  %v1870_v46 = vadd.f32 %v1862_v4, %v1837_v8 }
 0x127   : > { %1686 = vst.msk [vmem:[#allocation3 + $0x88] sm:$0xff] %vm1636_vm3, %v1607_v23 }
 0x128   : > { %1697 = vst.msk [vmem:[#allocation3 + $0x130] sm:$0xff] %vm1636_vm3, %v1618_v26  ;;  %v1903_v36 = vadd.f32 %v1895_v32, %v1870_v46  ;;  %v1732_v26 = vmul.f32 %v3605_v51, %v1719_v58  ;;  %v1754_v46 = vld [vmem:[#allocation3 + $0x108] ss:$2 sm:$0xff]  ;;  %v1884_v32 = vld [vmem:[#allocation3 + $0xe9] ss:$2 sm:$0xff] }
 0x12b   : > { %v1554_v34 = vpop.f32.mrf.mxu3 }
 0x12c   : > { %v1555_v43 = vadd.f32 %v3520_v20, %v1554_v34 }
 0x12d   : > { %v1494_v5 = vpop.f32.mrf.mxu0 }
 0x12e   : > { %v1596_v40 = vmax.f32 %v1555_v43, 0.0  ;;  %v1495_v54 = vadd.f32 %v3520_v20, %v1494_v5  ;;  %v1527_v6 = vpop.f32.mrf.mxu2  ;;  %v1798_v5 = vmul.f32 %v3611_v16, %v1785_v35 }
 0x12f   : > { %v1528_v21 = vadd.f32 %v3520_v20, %v1527_v6 }
 0x130   : > { %v1628_v10 = vmin.f32 %v1596_v40, 6.0  ;;  %v1576_v25 = vmax.f32 %v1495_v54, 0.0  ;;  %v1773_v40 = vadd.f32 %v1765_v31, %v1732_v26 }
 0x131   : > { %v1587_v2 = vmax.f32 %v1528_v21, 0.0 }
 0x132   : > { %1707 = vst.msk [vmem:[#allocation3 + $0x1d0] sm:$0xff] %vm1636_vm3, %v1628_v10  ;;  %v1608_v24 = vmin.f32 %v1576_v25, 6.0  ;;  %v1806_v27 = vadd.f32 %v1798_v5, %v1773_v40  ;;  %v1853_v5 = vld [vmem:[#allocation3 + $0x128] ss:$2 sm:$0xff] }
 0x133   : > { %v1619_v7 = vmin.f32 %v1587_v2, 6.0 }
 0x134   : > { %1687 = vst.msk [vmem:[#allocation3 + $0x90] sm:$0xff] %vm1636_vm3, %v1608_v24  ;;  %v1851_v24 = vld [vmem:[#allocation3 + $0xe8] ss:$2 sm:$0xff] }
 0x135   : > { %1698 = vst.msk [vmem:[#allocation3 + $0x148] sm:$0xff] %vm1636_vm3, %v1619_v7  ;;  %v1864_v47 = vmul.f32 %v3622_v50, %v1851_v24  ;;  %v1984_v24 = vld [vmem:[#allocation3 + $0x109] ss:$2 sm:$0xff] }
 0x138   : > { %v1557_v37 = vpop.f32.mrf.mxu3 }
 0x139   : > { %v1558_v59 = vadd.f32 %v3520_v20, %v1557_v37  ;;  %v1839_v37 = vadd.f32 %v1831_v1, %v1806_v27 }
 0x13b   : > { %v1597_v63 = vmax.f32 %v1558_v59, 0.0  ;;  %v1497_v38 = vpop.f32.mrf.mxu0  ;;  %v1914_v0 = vld [vmem:[#allocation3 + $0x87] ss:$2 sm:$0xff]  ;;  %v1947_v15 = vld [vmem:[#allocation3 + $0x88] ss:$2 sm:$0xff] }
 0x13c   : > { %v1498_v56 = vadd.f32 %v3520_v20, %v1497_v38  ;;  %v1929_v61 = vmul.f32 %v3638_v48, %v1914_v0  ;;  %v1980_v3 = vld [vmem:[#allocation3 + $0x89] ss:$2 sm:$0xff]  ;;  %v1962_v57 = vmul.f32 %v3641_v17, %v1947_v15  ;;  %v1750_v28 = vld [vmem:[#allocation3 + $0x88] ss:$2 sm:$0xff]  ;;  %v1766_v15 = vmul.f32 %v3607_v9, %v1754_v46 }
 0x13d   : > { %v1629_v44 = vmin.f32 %v1597_v63, 6.0  ;;  %v1530_v55 = vpop.f32.mrf.mxu2  ;;  %v1995_v12 = vmul.f32 %v3647_v41, %v1980_v3  ;;  %v1717_v7 = vld [vmem:[#allocation3 + $0x87] ss:$2 sm:$0xff]  ;;  %v1764_v38 = vmul.f32 %v3607_v9, %v1750_v28 }
 0x13e   : > { %v1577_v22 = vmax.f32 %v1498_v56, 0.0  ;;  %v1531_v18 = vadd.f32 %v3520_v20, %v1530_v55  ;;  %v1937_v53 = vadd.f32 %v1929_v61, %v1903_v36  ;;  %v1721_v59 = vld [vmem:[#allocation3 + $0x107] ss:$2 sm:$0xff]  ;;  %v1731_v63 = vmul.f32 %v3605_v51, %v1717_v7 }
 0x13f   : > { %1708 = vst.msk [vmem:[#allocation3 + $0x1e8] sm:$0xff] %vm1636_vm3, %v1629_v44  ;;  %v1918_v56 = vld [vmem:[#allocation3 + $0x107] ss:$2 sm:$0xff]  ;;  %v1733_v0 = vmul.f32 %v3605_v51, %v1721_v59  ;;  %v1872_v36 = vadd.f32 %v1864_v47, %v1839_v37  ;;  %v1897_v61 = vmul.f32 %v3626_v11, %v1884_v32  ;;  %v1865_v7 = vmul.f32 %v3622_v50, %v1853_v5  ;;  %v1949_v47 = vld [vmem:[#allocation3 + $0xc8] ss:$2 sm:$0xff] }
 0x140   : > { %v1609_v49 = vmin.f32 %v1577_v22, 6.0  ;;  %v1588_v19 = vmax.f32 %v1531_v18, 0.0  ;;  %v1970_v42 = vadd.f32 %v1962_v57, %v1937_v53  ;;  %v1783_v55 = vld [vmem:[#allocation3 + $0x89] ss:$2 sm:$0xff]  ;;  %v1772_v3 = vadd.f32 %v1764_v38, %v1731_v63 }
 0x141   : > { %v1787_v22 = vld [vmem:[#allocation3 + $0x109] ss:$2 sm:$0xff]  ;;  %v1931_v53 = vmul.f32 %v3638_v48, %v1918_v56  ;;  %v1774_v58 = vadd.f32 %v1766_v15, %v1733_v0 }
 0x142   : > { %1688 = vst.msk [vmem:[#allocation3 + $0xa8] sm:$0xff] %vm1636_vm3, %v1609_v49  ;;  %v1620_v23 = vmin.f32 %v1588_v19, 6.0  ;;  %v2003_v29 = vadd.f32 %v1995_v12, %v1970_v42  ;;  %v1820_v57 = vld [vmem:[#allocation3 + $0x127] ss:$2 sm:$0xff]  ;;  %v1797_v19 = vmul.f32 %v3611_v16, %v1783_v55  ;;  %v1799_v30 = vmul.f32 %v3611_v16, %v1787_v22 }
 0x143   : > { %v1886_v59 = vld [vmem:[#allocation3 + $0x129] ss:$2 sm:$0xff]  ;;  %v1997_v55 = vmul.f32 %v3647_v41, %v1984_v24 }
 0x144   : > { %1699 = vst.msk [vmem:[#allocation3 + $0x150] sm:$0xff] %vm1636_vm3, %v1620_v23  ;;  %v2014_v34 = vadd.f32 %v3656_v60, %v2003_v29  ;;  %v1905_v23 = vadd.f32 %v1897_v61, %v1872_v36  ;;  %v1951_v29 = vld [vmem:[#allocation3 + $0x108] ss:$2 sm:$0xff]  ;;  %v1805_v35 = vadd.f32 %v1797_v19, %v1772_v3  ;;  %v1791_v0 = vld [vmem:[#allocation3 + $0x189] ss:$2 sm:$0xff] }
 0x145   : > { %v1560_v45 = vpop.f32.mrf.mxu3 }
 0x146   : > { %v1561_v13 = vadd.f32 %v3520_v20, %v1560_v45  ;;  %v2022_v43 = vmax.f32 %v2014_v34, 0.0  ;;  %v1832_v45 = vmul.f32 %v3614_v33, %v1820_v57  ;;  %v1939_v40 = vadd.f32 %v1931_v53, %v1905_v23  ;;  %v1824_v23 = vld [vmem:[#allocation3 + $0x1a7] ss:$2 sm:$0xff] }
 0x147   : > { %v1898_v53 = vmul.f32 %v3626_v11, %v1886_v59  ;;  %v1834_v5 = vmul.f32 %v3614_v33, %v1824_v23 }
 0x148   : > { %v1598_v62 = vmax.f32 %v1561_v13, 0.0  ;;  %v1500_v54 = vpop.f32.mrf.mxu0  ;;  %v2030_v6 = vmin.f32 %v2022_v43, 6.0 }
 0x149   : > { %v1501_v39 = vadd.f32 %v3520_v20, %v1500_v54  ;;  %v1964_v54 = vmul.f32 %v3641_v17, %v1951_v29  ;;  %v1727_v29 = vld [vmem:[#allocation3 + $0x1c7] ss:$2 sm:$0xff] }
 0x14a   : > { %v1533_v10 = vpop.f32.mrf.mxu2  ;;  %v1630_v21 = vmin.f32 %v1598_v62, 6.0  ;;  %2284 = vmatmul.msk.f32.gmra.mxu1 %vm1636_vm3, %v2030_v6  ;;  %v1807_v6 = vadd.f32 %v1799_v30, %v1774_v58  ;;  %v1801_v58 = vmul.f32 %v3611_v16, %v1791_v0 }
 0x14b   : > { %v1534_v25 = vadd.f32 %v3520_v20, %v1533_v10  ;;  %v1578_v2 = vmax.f32 %v1501_v39, 0.0  ;;  %v1725_v39 = vld [vmem:[#allocation3 + $0x187] ss:$2 sm:$0xff]  ;;  %v1758_v10 = vld [vmem:[#allocation3 + $0x188] ss:$2 sm:$0xff]  ;;  %v1972_v56 = vadd.f32 %v1964_v54, %v1939_v40 }
 0x14c   : > { %1709 = vst.msk [vmem:[#allocation3 + $0x1f0] sm:$0xff] %vm1636_vm3, %v1630_v21  ;;  %v1723_v28 = vld [vmem:[#allocation3 + $0x147] ss:$2 sm:$0xff]  ;;  %v1735_v46 = vmul.f32 %v3605_v51, %v1725_v39  ;;  %v1768_v63 = vmul.f32 %v3607_v9, %v1758_v10 }
 0x14d   : > { %v1589_v14 = vmax.f32 %v1534_v25, 0.0  ;;  %v1610_v8 = vmin.f32 %v1578_v2, 6.0  ;;  %v1916_v25 = vld [vmem:[#allocation3 + $0xc7] ss:$2 sm:$0xff] }
 0x14e   : > { %v1930_v32 = vmul.f32 %v3638_v48, %v1916_v25  ;;  %v1920_v36 = vld [vmem:[#allocation3 + $0x147] ss:$2 sm:$0xff]  ;;  %v1776_v19 = vadd.f32 %v1768_v63, %v1735_v46 }
 0x14f   : > { %v1621_v4 = vmin.f32 %v1589_v14, 6.0  ;;  %1689 = vst.msk [vmem:[#allocation3 + $0xb0] sm:$0xff] %vm1636_vm3, %v1610_v8  ;;  %v1840_v14 = vadd.f32 %v1832_v45, %v1807_v6  ;;  %v1756_v8 = vld [vmem:[#allocation3 + $0x148] ss:$2 sm:$0xff]  ;;  %v1789_v57 = vld [vmem:[#allocation3 + $0x149] ss:$2 sm:$0xff] }
 0x150   : > { %v1767_v61 = vmul.f32 %v3607_v9, %v1756_v8  ;;  %v1809_v40 = vadd.f32 %v1801_v58, %v1776_v19 }
 0x151   : > { %1700 = vst.msk [vmem:[#allocation3 + $0x168] sm:$0xff] %vm1636_vm3, %v1621_v4  ;;  %v1873_v3 = vadd.f32 %v1865_v7, %v1840_v14  ;;  %v1793_v7 = vld [vmem:[#allocation3 + $0x1c9] ss:$2 sm:$0xff] }
 0x153   : > { %v1563_v44 = vpop.f32.mrf.mxu3  ;;  %v1859_v19 = vld [vmem:[#allocation3 + $0x1e8] ss:$2 sm:$0xff] }
 0x154   : > { %v1564_v18 = vadd.f32 %v3520_v20, %v1563_v44  ;;  %v1982_v44 = vld [vmem:[#allocation3 + $0xc9] ss:$2 sm:$0xff] }
 0x156   : > { %v1599_v49 = vmax.f32 %v1564_v18, 0.0  ;;  %v1816_v42 = vld [vmem:[#allocation3 + $0xa7] ss:$2 sm:$0xff]  ;;  %v1849_v12 = vld [vmem:[#allocation3 + $0xa8] ss:$2 sm:$0xff]  ;;  %v1963_v18 = vmul.f32 %v3641_v17, %v1949_v47 }
 0x157   : > { %v1536_v31 = vpop.f32.mrf.mxu2  ;;  %v1830_v34 = vmul.f32 %v3614_v33, %v1816_v42  ;;  %v1882_v43 = vld [vmem:[#allocation3 + $0xa9] ss:$2 sm:$0xff]  ;;  %v1863_v62 = vmul.f32 %v3622_v50, %v1849_v12  ;;  %v1996_v42 = vmul.f32 %v3647_v41, %v1982_v44  ;;  %v1932_v12 = vmul.f32 %v3638_v48, %v1920_v36 }
 0x158   : > { %v1631_v26 = vmin.f32 %v1599_v49, 6.0  ;;  %v1537_v13 = vadd.f32 %v3520_v20, %v1536_v31  ;;  %v1896_v2 = vmul.f32 %v3626_v11, %v1882_v43  ;;  %v1953_v31 = vld [vmem:[#allocation3 + $0x148] ss:$2 sm:$0xff]  ;;  %v1906_v43 = vadd.f32 %v1898_v53, %v1873_v3  ;;  %v1924_v3 = vld [vmem:[#allocation3 + $0x1c7] ss:$2 sm:$0xff] }
 0x159   : > { %v1838_v52 = vadd.f32 %v1830_v34, %v1805_v35  ;;  %v1800_v34 = vmul.f32 %v3611_v16, %v1789_v57  ;;  %v1965_v10 = vmul.f32 %v3641_v17, %v1953_v31 }
 0x15a   : > { %1710 = vst.msk [vmem:[#allocation3 + $0x208] sm:$0xff] %vm1636_vm3, %v1631_v26  ;;  %v1590_v21 = vmax.f32 %v1537_v13, 0.0  ;;  %v1760_v26 = vld [vmem:[#allocation3 + $0x1c8] ss:$2 sm:$0xff]  ;;  %v2005_v13 = vadd.f32 %v1997_v55, %v1972_v56  ;;  %v1940_v39 = vadd.f32 %v1932_v12, %v1906_v43  ;;  %v1802_v56 = vmul.f32 %v3611_v16, %v1793_v7 }
 0x15b   : > { %v1871_v1 = vadd.f32 %v1863_v62, %v1838_v52  ;;  %v1857_v52 = vld [vmem:[#allocation3 + $0x1a8] ss:$2 sm:$0xff]  ;;  %v1736_v62 = vmul.f32 %v3605_v51, %v1727_v29  ;;  %v1769_v54 = vmul.f32 %v3607_v9, %v1760_v26  ;;  %v1934_v12 = vmul.f32 %v3638_v48, %v1924_v3 }
 0x15c   : > { %v1566_v27 = vpop.f32.mrf.mxu3  ;;  %v1622_v4 = vmin.f32 %v1590_v21, 6.0  ;;  %v1867_v9 = vmul.f32 %v3622_v50, %v1857_v52  ;;  %v1973_v46 = vadd.f32 %v1965_v10, %v1940_v39  ;;  %v1957_v26 = vld [vmem:[#allocation3 + $0x1c8] ss:$2 sm:$0xff] }
 0x15d   : > { %v1567_v37 = vadd.f32 %v3520_v20, %v1566_v27  ;;  %v1904_v38 = vadd.f32 %v1896_v2, %v1871_v1  ;;  %v1734_v20 = vmul.f32 %v3605_v51, %v1723_v28  ;;  %v1986_v1 = vld [vmem:[#allocation3 + $0x149] ss:$2 sm:$0xff]  ;;  %v2016_v51 = vadd.f32 %v3656_v60, %v2005_v13 }
 0x15e   : > { %1701 = vst.msk [vmem:[#allocation3 + $0x170] sm:$0xff] %vm1636_vm3, %v1622_v4  ;;  %v1777_v47 = vadd.f32 %v1769_v54, %v1736_v62  ;;  %v1998_v63 = vmul.f32 %v3647_v41, %v1986_v1  ;;  %v1967_v13 = vmul.f32 %v3641_v17, %v1957_v26 }
 0x15f   : > { %v1600_v15 = vmax.f32 %v1567_v37, 0.0  ;;  %v1938_v22 = vadd.f32 %v1930_v32, %v1904_v38  ;;  %v1775_v35 = vadd.f32 %v1767_v61, %v1734_v20  ;;  %v1842_v37 = vadd.f32 %v1834_v5, %v1809_v40  ;;  %v1922_v38 = vld [vmem:[#allocation3 + $0x187] ss:$2 sm:$0xff]  ;;  %v1955_v20 = vld [vmem:[#allocation3 + $0x188] ss:$2 sm:$0xff] }
 0x160   : > { %v1890_v32 = vld [vmem:[#allocation3 + $0x1a9] ss:$2 sm:$0xff]  ;;  %v2024_v44 = vmax.f32 %v2016_v51, 0.0  ;;  %v1933_v36 = vmul.f32 %v3638_v48, %v1922_v38  ;;  %v1810_v53 = vadd.f32 %v1802_v56, %v1777_v47  ;;  %v1966_v16 = vmul.f32 %v3641_v17, %v1955_v20 }
 0x161   : > { %v1632_v49 = vmin.f32 %v1600_v15, 6.0  ;;  %v1971_v30 = vadd.f32 %v1963_v18, %v1938_v22  ;;  %v1808_v2 = vadd.f32 %v1800_v34, %v1775_v35  ;;  %v1826_v15 = vld [vmem:[#allocation3 + $0x1e7] ss:$2 sm:$0xff]  ;;  %v1875_v61 = vadd.f32 %v1867_v9, %v1842_v37 }
 0x162   : > { %v1900_v22 = vmul.f32 %v3626_v11, %v1890_v32  ;;  %v2006_v18 = vadd.f32 %v1998_v63, %v1973_v46  ;;  %v1835_v57 = vmul.f32 %v3614_v33, %v1826_v15  ;;  %v2032_v58 = vmin.f32 %v2024_v44, 6.0  ;;  %v1892_v34 = vld [vmem:[#allocation3 + $0x1e9] ss:$2 sm:$0xff] }
 0x163   : > { %1711 = vst.msk [vmem:[#allocation3 + $0x210] sm:$0xff] %vm1636_vm3, %v1632_v49  ;;  %v2004_v45 = vadd.f32 %v1996_v42, %v1971_v30  ;;  %v1988_v30 = vld [vmem:[#allocation3 + $0x189] ss:$2 sm:$0xff]  ;;  %v1868_v35 = vmul.f32 %v3622_v50, %v1859_v19  ;;  %v1901_v62 = vmul.f32 %v3626_v11, %v1892_v34 }
 0x164   : > { %v1908_v42 = vadd.f32 %v1900_v22, %v1875_v61  ;;  %v2017_v23 = vadd.f32 %v3656_v60, %v2006_v18  ;;  %v1843_v31 = vadd.f32 %v1835_v57, %v1810_v53  ;;  %v1990_v5 = vld [vmem:[#allocation3 + $0x1c9] ss:$2 sm:$0xff] }
 0x165   : > { %v2015_v6 = vadd.f32 %v3656_v60, %v2004_v45  ;;  %v1822_v21 = vld [vmem:[#allocation3 + $0x167] ss:$2 sm:$0xff]  ;;  %v1855_v25 = vld [vmem:[#allocation3 + $0x168] ss:$2 sm:$0xff]  ;;  %v2000_v39 = vmul.f32 %v3647_v41, %v1990_v5 }
 0x166   : > { %v1888_v27 = vld [vmem:[#allocation3 + $0x169] ss:$2 sm:$0xff]  ;;  %v1833_v24 = vmul.f32 %v3614_v33, %v1822_v21  ;;  %v1866_v14 = vmul.f32 %v3622_v50, %v1855_v25  ;;  %v1999_v33 = vmul.f32 %v3647_v41, %v1988_v30  ;;  %v1942_v45 = vadd.f32 %v1934_v12, %v1908_v42 }
 0x167   : > { %v2023_v28 = vmax.f32 %v2015_v6, 0.0  ;;  %v1899_v4 = vmul.f32 %v3626_v11, %v1888_v27  ;;  %v2025_v43 = vmax.f32 %v2017_v23, 0.0  ;;  %v1876_v52 = vadd.f32 %v1868_v35, %v1843_v31 }
 0x168   : > { %v1841_v8 = vadd.f32 %v1833_v24, %v1808_v2  ;;  %v1975_v6 = vadd.f32 %v1967_v13, %v1942_v45 }
 0x169   : > { %v2031_v59 = vmin.f32 %v2023_v28, 6.0  ;;  %v2033_v10 = vmin.f32 %v2025_v43, 6.0  ;;  %v1909_v21 = vadd.f32 %v1901_v62, %v1876_v52 }
 0x16a   : > { %v1874_v0 = vadd.f32 %v1866_v14, %v1841_v8  ;;  %v1926_v54 = vld [vmem:[#allocation3 + $0x207] ss:$2 sm:$0xff]  ;;  %v1959_v27 = vld [vmem:[#allocation3 + $0x208] ss:$2 sm:$0xff]  ;;  %v2008_v2 = vadd.f32 %v2000_v39, %v1975_v6 }
 0x16b   : > { %2285 = vmatmul.msk.f32.gmra.mxu1 %vm1636_vm3, %v2031_v59  ;;  %v1935_v25 = vmul.f32 %v3638_v48, %v1926_v54  ;;  %v1968_v11 = vmul.f32 %v3641_v17, %v1959_v27  ;;  %v1992_v14 = vld [vmem:[#allocation3 + $0x209] ss:$2 sm:$0xff]  ;;  %v2346_v17 = vld [vmem:[%s3828_s8] ss:$0 sm:$0xff] }
 0x16c   : > { %v1907_v55 = vadd.f32 %v1899_v4, %v1874_v0  ;;  %v2019_v28 = vadd.f32 %v3656_v60, %v2008_v2  ;;  %v2001_v9 = vmul.f32 %v3647_v41, %v1992_v14 }
 0x16d   : > { %v1943_v24 = vadd.f32 %v1935_v25, %v1909_v21 }
 0x16e   : > { %v1941_v49 = vadd.f32 %v1933_v36, %v1907_v55  ;;  %v2027_v48 = vmax.f32 %v2019_v28, 0.0 }
 0x16f   : > { %v1976_v51 = vadd.f32 %v1968_v11, %v1943_v24 }
 0x170   : > { %v1974_v29 = vadd.f32 %v1966_v16, %v1941_v49  ;;  %v2035_v4 = vmin.f32 %v2027_v48, 6.0 }
 0x171   : > { %v2009_v8 = vadd.f32 %v2001_v9, %v1976_v51 }
 0x172   : > { %v2007_v40 = vadd.f32 %v1999_v33, %v1974_v29 }
 0x173   : > { %2286 = vmatmul.msk.f32.gmra.mxu1 %vm1636_vm3, %v2032_v58  ;;  %v2020_v37 = vadd.f32 %v3656_v60, %v2009_v8 }
 0x174   : > { %v2018_v50 = vadd.f32 %v3656_v60, %v2007_v40 }
 0x175   : > { %v2028_v47 = vmax.f32 %v2020_v37, 0.0 }
 0x176   : > { %v2026_v1 = vmax.f32 %v2018_v50, 0.0 }
 0x177   : > { %v2036_v59 = vmin.f32 %v2028_v47, 6.0 }
 0x178   : > { %v2034_v7 = vmin.f32 %v2026_v1, 6.0 }
 0x17b   : > { %2287 = vmatmul.msk.f32.gmra.mxu1 %vm1636_vm3, %v2033_v10 }
 0x183   : > { %2288 = vmatmul.msk.f32.gmra.mxu1 %vm1636_vm3, %v2034_v7 }
 0x18b   : > { %2289 = vmatmul.msk.f32.gmra.mxu1 %vm1636_vm3, %v2035_v4 }
 0x18f   : > { %v2084_v41 = vpop.f32.mrf.mxu1 }
 0x190   : > { %v2085_v46 = vadd.f32 %v2346_v17, %v2084_v41 }
 0x192   : > { %2109 = vst.msk [vmem:[%s325_s26] sm:$0xff] %vm2108_vm4, %v2085_v46 }
 0x193   : > { %2290 = vmatmul.msk.f32.gmra.mxu1 %vm1636_vm3, %v2036_v59 }
 0x1c7   : > { %v2087_v60 = vpop.f32.mrf.mxu1 }
 0x1c8   : > { %v2088_v63 = vadd.f32 %v2346_v17, %v2087_v60 }
 0x1ca   : > { %2110 = vst.msk [vmem:[%s325_s26 + $0x8] sm:$0xff] %vm2108_vm4, %v2088_v63 }
 0x1e8   : > { %v2090_v38 = vpop.f32.mrf.mxu1 }
 0x1e9   : > { %v2091_v32 = vadd.f32 %v2346_v17, %v2090_v38 }
 0x1eb   : > { %2111 = vst.msk [vmem:[%s325_s26 + $0x10] sm:$0xff] %vm2108_vm4, %v2091_v32 }
 0x1f0   : > { %v2093_v56 = vpop.f32.mrf.mxu1 }
 0x1f1   : > { %v2094_v0 = vadd.f32 %v2346_v17, %v2093_v56 }
 0x1f3   : > { %2112 = vst.msk [vmem:[%s325_s26 + $0x18] sm:$0xff] %vm2108_vm4, %v2094_v0 }
 0x1f8   : > { %v2096_v15 = vpop.f32.mrf.mxu1 }
 0x1f9   : > { %v2097_v44 = vadd.f32 %v2346_v17, %v2096_v15 }
 0x1fb   : > { %2113 = vst.msk [vmem:[%s325_s26 + $0x20] sm:$0xff] %vm2108_vm4, %v2097_v44 }
 0x200   : > { %v2099_v55 = vpop.f32.mrf.mxu1 }
 0x201   : > { %v2100_v36 = vadd.f32 %v2346_v17, %v2099_v55 }
 0x203   : > { %2114 = vst.msk [vmem:[%s325_s26 + $0x28] sm:$0xff] %vm2108_vm4, %v2100_v36 }
 0x208   : > { %v2102_v20 = vpop.f32.mrf.mxu1 }
 0x209   : > { %v2103_v61 = vadd.f32 %v2346_v17, %v2102_v20 }
 0x20b   : > { %2115 = vst.msk [vmem:[%s325_s26 + $0x30] sm:$0xff] %vm2108_vm4, %v2103_v61 }
 0x210   : > { %v2105_v22 = vpop.f32.mrf.mxu1 }
 0x211   : > { %v2106_v18 = vadd.f32 %v2346_v17, %v2105_v22 }
 0x213   : > { %2116 = vst.msk [vmem:[%s325_s26 + $0x38] sm:$0xff] %vm2108_vm4, %v2106_v18 }
 0x214   : > { %2374 = shalt.err (!%p2371_p3)
}
 0x215   : > { %s2412_s22 = smov 128   ;;  %s2413_s26 = smov 8  }
 0x216   : > { %2301 = dma.vmem_to_hbm [thread:$0]  (%p2502_p5), %s2131_s16, 1024, %s2133_s17, %s2118_s21, %s2412_s22, %s2412_s22, %s2413_s26  }
 0x217 PF: > { %p2307_p4 = scmp.ge.s32.totalorder %s2409_s12, 2  ;;  %s2147_s14 = sand.u32 1, %s2397_s30  }
 0x218   : > { %s2148_s24 = scalar_lea.sflag [#allocation5], %s2147_s14 }
 0x219   : > { %p2304_p7 = pnand %p2307_p4, %p2506_p6 }
 0x21b   : > { %p2305_p8 = pneg %p2304_p7 }
 0x21d   : > { %2392 = dma.done.wait (%p2305_p8), %s2148_s24, 1024  }
 0x21e   : > { %2394 = vsyncadd (%p2305_p8), %s2148_s24, 4294966272  ;;  %p19_p9 = scmp.ge.s32.totalorder %s2489_s15, 4   ;;  %s3904_s30 = smov %s2401_s10 }
 0x21f   : > { %s3905_s10 = smov %s2405_s11  ;;  %s3906_s11 = smov %s2500_s18 }
 0x220   : > { %s3907_s12 = smov %s2489_s15  ;;  %21 = sbr.rel (!%p19_p9) target bundleno = 3 (0x3), region = 169 }
 0x225   :  { %2154 = vsyncpa [#allocation5], 1 }
 0x226   :  { %2156 = vsyncpa [#allocation5 + $0x1], 1 }

</bundles_post_ra>
